<compile_context>
chip_gen: v5e
topology: v5e:2x2
jax: 0.10.0
libtpu: 0.0.40
codegen_flags: <defaults>
</compile_context>

<pallas_src>
import jax
import jax.numpy as jnp
from jax.experimental import pallas as pl
from jax.experimental.pallas import tpu as pltpu

NZ = 64        # opt.nz (latent dim) -- small, deterministic choice
H1 = 256
H2 = 512
OUT = 2048
TN = 512       # layer-3 / output tile width (lane-dense, multiple of 128)
EPS = 1e-5


def _bn_relu(h, gamma, beta):
    # BatchNorm1d (training mode): normalize over the batch axis with biased
    # variance (one-pass E[x^2]-mean^2 form), affine, then ReLU.
    mean = jnp.mean(h, axis=0, keepdims=True)
    var = jnp.maximum(jnp.mean(h * h, axis=0, keepdims=True) - mean * mean, 0.0)
    hn = (h - mean) * jax.lax.rsqrt(var + EPS)
    hn = hn * gamma + beta
    return jnp.maximum(hn, 0.0)


def generator_kernel(x_ref,
                     w1_ref, g1_ref, b1_ref,
                     w2_ref, g2_ref, b2_ref,
                     w3_ref,
                     o_ref):
    # Activations are cast to bf16 before each MXU matmul; accumulation stays
    # in f32 via preferred_element_type.
    x = x_ref[...].astype(jnp.bfloat16)                    # [B, NZ]

    # ---- layer 1: Linear -> BN -> ReLU -------------------------------
    h1 = jnp.dot(x, w1_ref[...], preferred_element_type=jnp.float32)      # [B, 256]
    h1 = _bn_relu(h1, g1_ref[...], b1_ref[...])

    # ---- layer 2: Linear -> BN -> ReLU -------------------------------
    h2 = jnp.dot(h1.astype(jnp.bfloat16), w2_ref[...],
                 preferred_element_type=jnp.float32)                       # [B, 512]
    h2 = _bn_relu(h2, g2_ref[...], b2_ref[...])

    # ---- layer 3 (tiled over OUT): Linear -> Tanh ---------------------
    h3 = jnp.dot(h2.astype(jnp.bfloat16), w3_ref[...],
                 preferred_element_type=jnp.float32)                       # [B, TN]
    # (A bf16 tanh would be slightly faster on v6e/v7x EUP, but is a
    #  pessimization on v5e; keep f32 for portability.)
    o_ref[...] = jnp.tanh(h3).astype(o_ref.dtype)


def generator_forward(x, params):
    """x: [B, NZ] float32.  params: dict of transposed bf16 weights + BN affine."""
    B = x.shape[0]
    w1, g1, b1, w2, g2, b2, w3 = (params["w1"], params["g1"], params["b1"],
                                  params["w2"], params["g2"], params["b2"],
                                  params["w3"])

    def resident_spec(shape):
        # Same block index every grid step -> stays resident in VMEM.
        return pl.BlockSpec(shape, lambda j: tuple(0 for _ in shape))

    n_tiles = OUT // TN

    flops = 2 * B * (NZ * H1 + H1 * H2 + H2 * OUT)
    bytes_accessed = (x.size * 4 + w1.size * 2 + w2.size * 2 + w3.size * 2
                      + (g1.size + b1.size + g2.size + b2.size) * 4
                      + B * OUT * 4)

    return pl.pallas_call(
        generator_kernel,
        out_shape=jax.ShapeDtypeStruct((B, OUT), jnp.float32),
        grid=(n_tiles,),
        in_specs=[
            resident_spec(x.shape),
            resident_spec(w1.shape), resident_spec(g1.shape), resident_spec(b1.shape),
            resident_spec(w2.shape), resident_spec(g2.shape), resident_spec(b2.shape),
            pl.BlockSpec((H2, TN), lambda j: (0, j)),       # streamed w3 tile
        ],
        out_specs=pl.BlockSpec((B, TN), lambda j: (0, j)),  # lane-dense output tile
        compiler_params=pltpu.CompilerParams(
            dimension_semantics=("parallel",),              # megacore on v7x
            vmem_limit_bytes=16 << 20,
        ),
        cost_estimate=pl.CostEstimate(
            flops=flops,
            transcendentals=B * OUT,
            bytes_accessed=bytes_accessed,
        ),
    )(x, w1, g1, b1, w2, g2, b2, w3)


def init_params(key):
    """Deterministic synthetic parameters (PyTorch shapes, transposed, bf16 weights)."""
    k1, k2, k3, kg1, kb1, kg2, kb2 = jax.random.split(key, 7)
    # PyTorch nn.Linear stores weight as (out, in); transpose once here so the
    # kernel multiplies [B,in] @ [in,out].
    w1_pt = jax.random.normal(k1, (H1, NZ), jnp.float32) * 0.05
    w2_pt = jax.random.normal(k2, (H2, H1), jnp.float32) * 0.05
    w3_pt = jax.random.normal(k3, (OUT, H2), jnp.float32) * 0.05
    # BatchNorm1d default init is gamma=1, beta=0; perturb deterministically so
    # the affine path is exercised.  BN affine stays f32.
    g1 = 1.0 + 0.1 * jax.random.normal(kg1, (1, H1), jnp.float32)
    b1 = 0.1 * jax.random.normal(kb1, (1, H1), jnp.float32)
    g2 = 1.0 + 0.1 * jax.random.normal(kg2, (1, H2), jnp.float32)
    b2 = 0.1 * jax.random.normal(kb2, (1, H2), jnp.float32)
    return {
        "w1": w1_pt.T.astype(jnp.bfloat16), "g1": g1, "b1": b1,
        "w2": w2_pt.T.astype(jnp.bfloat16), "g2": g2, "b2": b2,
        "w3": w3_pt.T.astype(jnp.bfloat16),
    }


def reference_forward_mirrored(x, params):
    """Pure-JAX reference mirroring the kernel numerics (bf16 matmuls, f32 acc)."""
    def dot_bf16(a, w):
        return jnp.dot(a.astype(jnp.bfloat16), w, preferred_element_type=jnp.float32)

    def bn_relu(h, g, b):
        m = jnp.mean(h, axis=0, keepdims=True)
        v = jnp.maximum(jnp.mean(h * h, axis=0, keepdims=True) - m * m, 0.0)
        return jnp.maximum((h - m) * jax.lax.rsqrt(v + EPS) * g + b, 0.0)

    h = bn_relu(dot_bf16(x, params["w1"]), params["g1"], params["b1"])
    h = bn_relu(dot_bf16(h, params["w2"]), params["g2"], params["b2"])
    return jnp.tanh(dot_bf16(h, params["w3"]))


def reference_forward_f32(x, params):
    """Full-f32 reference mirroring the original PyTorch module (training-mode BN)."""
    w1 = params["w1"].astype(jnp.float32)
    w2 = params["w2"].astype(jnp.float32)
    w3 = params["w3"].astype(jnp.float32)

    def bn_relu(h, g, b):
        m = jnp.mean(h, axis=0, keepdims=True)
        v = jnp.mean((h - m) ** 2, axis=0, keepdims=True)
        return jnp.maximum((h - m) / jnp.sqrt(v + EPS) * g + b, 0.0)

    h = bn_relu(x @ w1, params["g1"], params["b1"])
    h = bn_relu(h @ w2, params["g2"], params["b2"])
    return jnp.tanh(h @ w3)


if __name__ == "__main__":
    key = jax.random.PRNGKey(0)
    kx, kp = jax.random.split(key)

    B = 8                               # small batch (>1 so BatchNorm is well defined)
    x = jax.random.normal(kx, (B, NZ), jnp.float32)
    params = init_params(kp)

    out = generator_forward(x, params)
    out = jax.block_until_ready(out)
    assert out.shape == (B, OUT), out.shape

    # Tight check vs. a reference with the same (bf16-weight) numerics.
    ref_bf16 = reference_forward_mirrored(x, params)
    assert jnp.allclose(out, ref_bf16, atol=1e-3, rtol=1e-3), "mismatch vs bf16 reference"

    # Loose semantic check vs. the full-f32 PyTorch-equivalent math
    # (bf16 weights introduce ~1e-2 absolute deviation on the tanh output).
    ref_f32 = reference_forward_f32(x, params)
    assert jnp.allclose(out, ref_f32, atol=1e-1), "mismatch vs f32 semantic reference"

    print("KERNEL_OK")
</pallas_src>

<mosaic_0001>
module attributes {stable_mosaic.version = 11 : i64} {
  func.func @generator_kernel(%arg0: i32, %arg1: memref<8x64xf32, #tpu.memory_space<vmem>>, %arg2: memref<64x256xbf16, #tpu.memory_space<vmem>>, %arg3: memref<1x256xf32, #tpu.memory_space<vmem>>, %arg4: memref<1x256xf32, #tpu.memory_space<vmem>>, %arg5: memref<256x512xbf16, #tpu.memory_space<vmem>>, %arg6: memref<1x512xf32, #tpu.memory_space<vmem>>, %arg7: memref<1x512xf32, #tpu.memory_space<vmem>>, %arg8: memref<512x512xbf16, #tpu.memory_space<vmem>>, %arg9: memref<8x512xf32, #tpu.memory_space<vmem>>) attributes {dimension_semantics = [#tpu.dimension_semantics<parallel>], iteration_bounds = array<i64: 4>, scalar_prefetch = 0 : i64, scratch_operands = 0 : i64, tpu.core_type = #tpu.core_type<tc>, window_params = [{pipeline_mode = #tpu.pipeline_mode<synchronous>, transform_indices = @transform_0, window_bounds = array<i64: 8, 64>}, {pipeline_mode = #tpu.pipeline_mode<synchronous>, transform_indices = @transform_1, window_bounds = array<i64: 64, 256>}, {pipeline_mode = #tpu.pipeline_mode<synchronous>, transform_indices = @transform_2, window_bounds = array<i64: 1, 256>}, {pipeline_mode = #tpu.pipeline_mode<synchronous>, transform_indices = @transform_3, window_bounds = array<i64: 1, 256>}, {pipeline_mode = #tpu.pipeline_mode<synchronous>, transform_indices = @transform_4, window_bounds = array<i64: 256, 512>}, {pipeline_mode = #tpu.pipeline_mode<synchronous>, transform_indices = @transform_5, window_bounds = array<i64: 1, 512>}, {pipeline_mode = #tpu.pipeline_mode<synchronous>, transform_indices = @transform_6, window_bounds = array<i64: 1, 512>}, {transform_indices = @transform_7, window_bounds = array<i64: 512, 512>}, {transform_indices = @transform_8, window_bounds = array<i64: 8, 512>}]} {
    %c0 = arith.constant 0 : index
    %c0_0 = arith.constant 0 : index
    %0 = vector.load %arg1[%c0, %c0_0] : memref<8x64xf32, #tpu.memory_space<vmem>>, vector<8x64xf32>
    %1 = arith.truncf %0 : vector<8x64xf32> to vector<8x64xbf16>
    %c0_1 = arith.constant 0 : index
    %c0_2 = arith.constant 0 : index
    %2 = vector.load %arg2[%c0_1, %c0_2] : memref<64x256xbf16, #tpu.memory_space<vmem>>, vector<64x256xbf16>
    %cst = arith.constant dense<0.000000e+00> : vector<8x256xf32>
    %3 = tpu.matmul %1, %2, %cst {dimension_numbers = #tpu.dot_dimension_numbers<[1], [0], [0], [1], [0, 0, 1, 1], [], []>} : vector<8x64xbf16>, vector<64x256xbf16>, vector<8x256xf32> -> vector<8x256xf32>
    %c0_3 = arith.constant 0 : index
    %c0_4 = arith.constant 0 : index
    %4 = vector.load %arg3[%c0_3, %c0_4] : memref<1x256xf32, #tpu.memory_space<vmem>>, vector<1x256xf32>
    %c0_5 = arith.constant 0 : index
    %c0_6 = arith.constant 0 : index
    %5 = vector.load %arg4[%c0_5, %c0_6] : memref<1x256xf32, #tpu.memory_space<vmem>>, vector<1x256xf32>
    %cst_7 = arith.constant dense<0.000000e+00> : vector<256xf32>
    %6 = vector.multi_reduction <add>, %3, %cst_7 [0] : vector<8x256xf32> to vector<256xf32>
    %7 = vector.shape_cast %6 : vector<256xf32> to vector<1x256xf32>
    %cst_8 = arith.constant 8.000000e+00 : f32
    %8 = vector.broadcast %cst_8 : f32 to vector<1x256xf32>
    %9 = arith.divf %7, %8 : vector<1x256xf32>
    %10 = arith.mulf %3, %3 : vector<8x256xf32>
    %cst_9 = arith.constant dense<0.000000e+00> : vector<256xf32>
    %11 = vector.multi_reduction <add>, %10, %cst_9 [0] : vector<8x256xf32> to vector<256xf32>
    %12 = vector.shape_cast %11 : vector<256xf32> to vector<1x256xf32>
    %cst_10 = arith.constant 8.000000e+00 : f32
    %13 = vector.broadcast %cst_10 : f32 to vector<1x256xf32>
    %14 = arith.divf %12, %13 : vector<1x256xf32>
    %15 = arith.mulf %9, %9 : vector<1x256xf32>
    %16 = arith.subf %14, %15 : vector<1x256xf32>
    %cst_11 = arith.constant 0.000000e+00 : f32
    %17 = vector.broadcast %cst_11 : f32 to vector<1x256xf32>
    %18 = arith.maximumf %16, %17 : vector<1x256xf32>
    %19 = vector.broadcast %9 : vector<1x256xf32> to vector<8x256xf32>
    %20 = arith.subf %3, %19 : vector<8x256xf32>
    %cst_12 = arith.constant 9.99999974E-6 : f32
    %21 = vector.broadcast %cst_12 : f32 to vector<1x256xf32>
    %22 = arith.addf %18, %21 : vector<1x256xf32>
    %23 = math.rsqrt %22 : vector<1x256xf32>
    %24 = vector.broadcast %23 : vector<1x256xf32> to vector<8x256xf32>
    %25 = arith.mulf %20, %24 : vector<8x256xf32>
    %26 = vector.broadcast %4 : vector<1x256xf32> to vector<8x256xf32>
    %27 = arith.mulf %25, %26 : vector<8x256xf32>
    %28 = vector.broadcast %5 : vector<1x256xf32> to vector<8x256xf32>
    %29 = arith.addf %27, %28 : vector<8x256xf32>
    %cst_13 = arith.constant 0.000000e+00 : f32
    %30 = vector.broadcast %cst_13 : f32 to vector<8x256xf32>
    %31 = arith.maximumf %29, %30 : vector<8x256xf32>
    %32 = arith.truncf %31 : vector<8x256xf32> to vector<8x256xbf16>
    %c0_14 = arith.constant 0 : index
    %c0_15 = arith.constant 0 : index
    %33 = vector.load %arg5[%c0_14, %c0_15] : memref<256x512xbf16, #tpu.memory_space<vmem>>, vector<256x512xbf16>
    %cst_16 = arith.constant dense<0.000000e+00> : vector<8x512xf32>
    %34 = tpu.matmul %32, %33, %cst_16 {dimension_numbers = #tpu.dot_dimension_numbers<[1], [0], [0], [1], [0, 0, 1, 1], [], []>} : vector<8x256xbf16>, vector<256x512xbf16>, vector<8x512xf32> -> vector<8x512xf32>
    %c0_17 = arith.constant 0 : index
    %c0_18 = arith.constant 0 : index
    %35 = vector.load %arg6[%c0_17, %c0_18] : memref<1x512xf32, #tpu.memory_space<vmem>>, vector<1x512xf32>
    %c0_19 = arith.constant 0 : index
    %c0_20 = arith.constant 0 : index
    %36 = vector.load %arg7[%c0_19, %c0_20] : memref<1x512xf32, #tpu.memory_space<vmem>>, vector<1x512xf32>
    %cst_21 = arith.constant dense<0.000000e+00> : vector<512xf32>
    %37 = vector.multi_reduction <add>, %34, %cst_21 [0] : vector<8x512xf32> to vector<512xf32>
    %38 = vector.shape_cast %37 : vector<512xf32> to vector<1x512xf32>
    %cst_22 = arith.constant 8.000000e+00 : f32
    %39 = vector.broadcast %cst_22 : f32 to vector<1x512xf32>
    %40 = arith.divf %38, %39 : vector<1x512xf32>
    %41 = arith.mulf %34, %34 : vector<8x512xf32>
    %cst_23 = arith.constant dense<0.000000e+00> : vector<512xf32>
    %42 = vector.multi_reduction <add>, %41, %cst_23 [0] : vector<8x512xf32> to vector<512xf32>
    %43 = vector.shape_cast %42 : vector<512xf32> to vector<1x512xf32>
    %cst_24 = arith.constant 8.000000e+00 : f32
    %44 = vector.broadcast %cst_24 : f32 to vector<1x512xf32>
    %45 = arith.divf %43, %44 : vector<1x512xf32>
    %46 = arith.mulf %40, %40 : vector<1x512xf32>
    %47 = arith.subf %45, %46 : vector<1x512xf32>
    %cst_25 = arith.constant 0.000000e+00 : f32
    %48 = vector.broadcast %cst_25 : f32 to vector<1x512xf32>
    %49 = arith.maximumf %47, %48 : vector<1x512xf32>
    %50 = vector.broadcast %40 : vector<1x512xf32> to vector<8x512xf32>
    %51 = arith.subf %34, %50 : vector<8x512xf32>
    %cst_26 = arith.constant 9.99999974E-6 : f32
    %52 = vector.broadcast %cst_26 : f32 to vector<1x512xf32>
    %53 = arith.addf %49, %52 : vector<1x512xf32>
    %54 = math.rsqrt %53 : vector<1x512xf32>
    %55 = vector.broadcast %54 : vector<1x512xf32> to vector<8x512xf32>
    %56 = arith.mulf %51, %55 : vector<8x512xf32>
    %57 = vector.broadcast %35 : vector<1x512xf32> to vector<8x512xf32>
    %58 = arith.mulf %56, %57 : vector<8x512xf32>
    %59 = vector.broadcast %36 : vector<1x512xf32> to vector<8x512xf32>
    %60 = arith.addf %58, %59 : vector<8x512xf32>
    %cst_27 = arith.constant 0.000000e+00 : f32
    %61 = vector.broadcast %cst_27 : f32 to vector<8x512xf32>
    %62 = arith.maximumf %60, %61 : vector<8x512xf32>
    %63 = arith.truncf %62 : vector<8x512xf32> to vector<8x512xbf16>
    %c0_28 = arith.constant 0 : index
    %c0_29 = arith.constant 0 : index
    %64 = vector.load %arg8[%c0_28, %c0_29] : memref<512x512xbf16, #tpu.memory_space<vmem>>, vector<512x512xbf16>
    %cst_30 = arith.constant dense<0.000000e+00> : vector<8x512xf32>
    %65 = tpu.matmul %63, %64, %cst_30 {dimension_numbers = #tpu.dot_dimension_numbers<[1], [0], [0], [1], [0, 0, 1, 1], [], []>} : vector<8x512xbf16>, vector<512x512xbf16>, vector<8x512xf32> -> vector<8x512xf32>
    %66 = math.tanh %65 : vector<8x512xf32>
    %c0_31 = arith.constant 0 : index
    %c0_32 = arith.constant 0 : index
    %67 = vector.load %arg9[%c0_31, %c0_32] : memref<8x512xf32, #tpu.memory_space<vmem>>, vector<8x512xf32>
    tpu.vector_store %arg9[%c0_31, %c0_32], %66 {strides = array<i32>} : memref<8x512xf32, #tpu.memory_space<vmem>>, vector<8x512xf32>,
    return
  }
  func.func @transform_0(%arg0: i32) -> (i32, i32) {
    %c0_i32 = arith.constant 0 : i32
    %c0_i32_0 = arith.constant 0 : i32
    %c0_i32_1 = arith.constant 0 : i32
    return %c0_i32, %c0_i32_0 : i32, i32
  }
  func.func @transform_1(%arg0: i32) -> (i32, i32) {
    %c0_i32 = arith.constant 0 : i32
    %c0_i32_0 = arith.constant 0 : i32
    %c0_i32_1 = arith.constant 0 : i32
    return %c0_i32, %c0_i32_0 : i32, i32
  }
  func.func @transform_2(%arg0: i32) -> (i32, i32) {
    %c0_i32 = arith.constant 0 : i32
    %c0_i32_0 = arith.constant 0 : i32
    %c0_i32_1 = arith.constant 0 : i32
    return %c0_i32, %c0_i32_0 : i32, i32
  }
  func.func @transform_3(%arg0: i32) -> (i32, i32) {
    %c0_i32 = arith.constant 0 : i32
    %c0_i32_0 = arith.constant 0 : i32
    %c0_i32_1 = arith.constant 0 : i32
    return %c0_i32, %c0_i32_0 : i32, i32
  }
  func.func @transform_4(%arg0: i32) -> (i32, i32) {
    %c0_i32 = arith.constant 0 : i32
    %c0_i32_0 = arith.constant 0 : i32
    %c0_i32_1 = arith.constant 0 : i32
    return %c0_i32, %c0_i32_0 : i32, i32
  }
  func.func @transform_5(%arg0: i32) -> (i32, i32) {
    %c0_i32 = arith.constant 0 : i32
    %c0_i32_0 = arith.constant 0 : i32
    %c0_i32_1 = arith.constant 0 : i32
    return %c0_i32, %c0_i32_0 : i32, i32
  }
  func.func @transform_6(%arg0: i32) -> (i32, i32) {
    %c0_i32 = arith.constant 0 : i32
    %c0_i32_0 = arith.constant 0 : i32
    %c0_i32_1 = arith.constant 0 : i32
    return %c0_i32, %c0_i32_0 : i32, i32
  }
  func.func @transform_7(%arg0: i32) -> (i32, i32) {
    %c0_i32 = arith.constant 0 : i32
    %c0_i32_0 = arith.constant 0 : i32
    return %c0_i32, %arg0 : i32, i32
  }
  func.func @transform_8(%arg0: i32) -> (i32, i32) {
    %c0_i32 = arith.constant 0 : i32
    %c0_i32_0 = arith.constant 0 : i32
    return %c0_i32, %arg0 : i32, i32
  }
}

</mosaic_0001>

<bundles_post_ra>
// kernel: tpu_custom_call.1
= control target key start
LH: loop header
LB: loop body
LE: loop exit
PB: predicated region body
PF: predicated region fallthrough
CT: control target
= control target key end

     0   :  { %s4572_s0 = inlined_call_operand.hbm [shape: f32[8,64], index: 0, kind: input, shape index: {}]   ;;  %s4573_s1 = inlined_call_operand.hbm [shape: bf16[64,256], index: 1, kind: input, shape index: {}]   ;;  %s4574_s2 = inlined_call_operand.hbm [shape: f32[1,256], index: 2, kind: input, shape index: {}]   ;;  %s4575_s3 = inlined_call_operand.hbm [shape: f32[1,256], index: 3, kind: input, shape index: {}]   ;;  %s4576_s4 = inlined_call_operand.hbm [shape: bf16[256,512], index: 4, kind: input, shape index: {}]   ;;  %s4577_s5 = inlined_call_operand.hbm [shape: f32[1,512], index: 5, kind: input, shape index: {}]   ;;  %s4578_s6 = inlined_call_operand.hbm [shape: f32[1,512], index: 6, kind: input, shape index: {}]   ;;  %s4579_s7 = inlined_call_operand.hbm [shape: bf16[512,2048], index: 7, kind: input, shape index: {}]   ;;  %s4580_s8 = inlined_call_operand.hbm [shape: f32[8,2048], index: 8, kind: output, shape index: {}]  }
   0x1   :  { %4583 = sst [smem:[#allocation23_spill]] %s4572_s0 }
   0x2   :  { %4584 = sst [smem:[#allocation24_spill]] %s4573_s1 }
   0x3   :  { %4585 = sst [smem:[#allocation25_spill]] %s4574_s2 }
   0x4   :  { %13 = vsyncpa [#allocation3], 0 }
   0x5   :  { %14 = vsyncpa [#allocation6], 0 }
   0x6   :  { %15 = vsyncpa [#allocation9], 0 }
   0x7   :  { %16 = vsyncpa [#allocation12], 0 }
   0x8   :  { %17 = vsyncpa [#allocation15], 0 }
   0x9   :  { %19 = vsyncpa [#allocation15 + $0x1], 0 }
   0xa   :  { %20 = vsyncpa [#allocation4], 0 }
   0xb   :  { %22 = vsyncpa [#allocation4 + $0x1], 0  ;;  %s3951_s27 = smov 0   ;;  %s3953_s28 = smov 0  }
   0xc   :  { %s3955_s29 = smov 0   ;;  %s3957_s30 = smov 0  }
   0xd LB: > { %s4586_s1 = sld [smem:[#allocation24_spill]]  ;;  %s3975_s12 = sadd.s32 4294967295, %s3891_s30   ;;  %s3891_s30 = sphi %s3957_s30, %s4601_s30   ;;  %s3887_s29 = sphi %s3955_s29, %s4600_s29   ;;  %s3883_s28 = sphi %s3953_s28, %s4599_s28   ;;  %s3879_s27 = sphi %s3951_s27, %s4598_s27  }
   0xe   : > { %p2393_p0 = scmp.ge.s32.totalorder %s3891_s30, 1  ;;  %p196_p1 = scmp.eq.s32.totalorder %s3975_s12, 0 }
   0xf   : > { %p232_p2 = scmp.lt.s32.totalorder %s3891_s30, 5  ;;  %s3893_s14 = smov [#allocation5]  }
  0x10   : > { %s257_s15 = sshll.u32 %s3893_s14, 4  ;;  %s282_s18 = sshll.u32 %s4575_s3, 4  ;;  %s258_s15 = int_to_ptr.vmem [resolvable:$true] %s257_s15  ;;  %s283_s18 = int_to_ptr.hbm [resolvable:$true] %s282_s18 }
  0x11   : > { %p3980_p3 = pnand %p2393_p0, %p232_p2  ;;  %s308_s22 = sshll.u32 %s4577_s5, 4  ;;  %s309_s22 = int_to_ptr.hbm [resolvable:$true] %s308_s22 }
  0x12   : > { %s3894_s23 = smov [#allocation8]   ;;  %s3895_s25 = smov 128  }
  0x13   : > { %s255_s11 = sshll.u32 %s4586_s1, 4  ;;  %p3456_p4 = pneg %p3980_p3  ;;  %s256_s11 = int_to_ptr.hbm [resolvable:$true] %s255_s11 }
  0x14   : > { %s284_s24 = sshll.u32 %s3894_s23, 4  ;;  %s3896_s26 = smov 8   ;;  %s285_s24 = int_to_ptr.vmem [resolvable:$true] %s284_s24 }
  0x15   : > { %p3991_p5 = pnand %p3456_p4, %p196_p1  ;;  %s4589_s0 = sld [smem:[#allocation23_spill]] }
  0x16   : > { %s3897_s16 = smov [#allocation11]   ;;  %s3898_s20 = smov [#allocation2]  }
  0x17   : > { %3462 = dma.hbm_to_vmem [thread:$0]  (!%p3991_p5), %s256_s11, 1024, %s258_s15, [#allocation6], %s3895_s25, %s3895_s25, %s3896_s26  }
  0x18   : > { %3468 = dma.hbm_to_vmem [thread:$0]  (!%p3991_p5), %s283_s18, 32, %s285_s24, [#allocation9]  }
  0x19   : > { %s310_s17 = sshll.u32 %s3897_s16, 4  ;;  %s246_s21 = sshll.u32 %s3898_s20, 4  ;;  %s311_s17 = int_to_ptr.vmem [resolvable:$true] %s310_s17  ;;  %s247_s21 = int_to_ptr.vmem [resolvable:$true] %s246_s21 }
  0x1a   : > { %3474 = dma.hbm_to_vmem [thread:$0]  (!%p3991_p5), %s309_s22, 64, %s311_s17, [#allocation12]  }
  0x1b   : > { %s244_s14 = sshll.u32 %s4589_s0, 4  ;;  %s4590_s2 = sld [smem:[#allocation25_spill]]  ;;  %s245_s14 = int_to_ptr.hbm [resolvable:$true] %s244_s14 }
  0x1c   : > { %3459 = dma.hbm_to_vmem [thread:$0]  (!%p3991_p5), %s245_s14, 128, %s247_s21, [#allocation3]  }
  0x1d   : > { %s293_s24 = sshll.u32 %s4576_s4, 4  ;;  %s3899_s25 = smov [#allocation7]   ;;  %s294_s24 = int_to_ptr.hbm [resolvable:$true] %s293_s24 }
  0x1e   : > { %s272_s26 = sshll.u32 %s3899_s25, 4  ;;  %s3900_s1 = smov [#allocation10]   ;;  %s273_s26 = int_to_ptr.vmem [resolvable:$true] %s272_s26 }
  0x1f   : > { %s295_s22 = sshll.u32 %s3900_s1, 4  ;;  %s4581_s9 = smov 256   ;;  %s296_s22 = int_to_ptr.vmem [resolvable:$true] %s295_s22 }
  0x20   : > { %s4582_s10 = smov 16   ;;  %s320_s17 = sshll.u32 %s4578_s6, 4  ;;  %s321_s17 = int_to_ptr.hbm [resolvable:$true] %s320_s17 }
  0x21   : > { %s270_s11 = sshll.u32 %s4590_s2, 4  ;;  %s3903_s20 = smov [#allocation13]   ;;  %s271_s11 = int_to_ptr.hbm [resolvable:$true] %s270_s11 }
  0x22   : > { %3465 = dma.hbm_to_vmem [thread:$0]  (!%p3991_p5), %s271_s11, 32, %s273_s26, [#allocation6]  }
  0x23   : > { %3471 = dma.hbm_to_vmem [thread:$0]  (!%p3991_p5), %s294_s24, 8192, %s296_s22, [#allocation9], %s4581_s9, %s4581_s9, %s4582_s10  }
  0x24   : > { %s322_s21 = sshll.u32 %s3903_s20, 4  ;;  %s2392_s23 = sadd.s32 4294967294, %s3891_s30   ;;  %s323_s21 = int_to_ptr.vmem [resolvable:$true] %s322_s21 }
  0x25   : > { %3477 = dma.hbm_to_vmem [thread:$0]  (!%p3991_p5), %s321_s17, 64, %s323_s21, [#allocation12]  }
  0x26   : > { %s4029_s11 = sadd.s32 1, %s3891_s30   ;;  %s182_s15 = sadd.s32 1, %s3887_s29 }
  0x27   : > { %s179_s18 = ssub.s32 %s3891_s30, %s4029_s11  ;;  %p189_p6 = scmp.ne.s32.totalorder %s3887_s29, %s3883_s28 }
  0x28   : > { %p180_p7 = scmp.eq.s32.totalorder %s179_s18, 0  ;;  %p190_p8 = scmp.eq.s32.totalorder %s3891_s30, 0 }
  0x29   : > { %p195_p9 = scmp.ne.s32.totalorder %s3883_s28, %s3879_s27  ;;  %p219_p10 = scmp.eq.s32.totalorder %s3975_s12, 3 }
  0x2a   : > { %s4041_s24 = scalar_select %p180_p7, %s3887_s29, %s182_s15  }
  0x2b   : > { %p4043_p11 = por %p190_p8, %p189_p6  ;;  %p4049_p12 = por %p196_p1, %p195_p9 }
  0x2c   : > { %p4053_p13 = por %p219_p10, %p189_p6  ;;  %p225_p0 = scmp.eq.s32.totalorder %s2392_s23, 3 }
  0x2d   : > { %p3493_p2 = scmp.lt.s32.totalorder %s3891_s30, 4  ;;  %s333_s1 = sand.u32 1, %s3887_s29  }
  0x2e   : > { %p4059_p4 = por %p225_p0, %p195_p9  ;;  %s2402_s14 = sshll.u32 %s333_s1, 10 }
  0x2f   : > { %s3222_s16 = sshll.u32 %s3891_s30, 4  ;;  %s337_s18 = scalar_lea.vmem [#allocation14], %s2402_s14 }
  0x30   : > { %s342_s21 = scalar_lea.hbm %s4579_s7, %s3222_s16  ;;  %s345_s9 = sshll.u32 %s337_s18, 4  ;;  %s346_s9 = int_to_ptr.vmem [resolvable:$true] %s345_s9 }
  0x31   : > { %s343_s15 = sshll.u32 %s342_s21, 4  ;;  %p4069_p5 = pnand %p3493_p2, %p4043_p11  ;;  %s344_s15 = int_to_ptr.hbm [resolvable:$true] %s343_s15 }
  0x32   : > { %s334_s10 = scalar_lea.sflag [#allocation15], %s333_s1  ;;  %s3779_s0 = sshra.s32 %s344_s15, 4  ;;  %s3780_s0 = int_to_ptr.hbm [resolvable:$true] %s3779_s0 }
  0x33   : > { %s3781_s2 = scalar_lea.hbm %s3780_s0, 1024  ;;  %p3783_p7 = pneg %p4069_p5 }
  0x34   : > { %p3782_p6 = scmp.ne.s32.totalorder %s3780_s0, %s3781_s2  ;;  %s3786_s17 = scalar_lea.hbm %s4579_s7, 4096 }
  0x35   : > { %p3787_p10 = scmp.lt.s32.totalorder %s3780_s0, %s4579_s7  ;;  %p3788_p11 = scmp.lt.s32.totalorder %s3786_s17, %s3781_s2 }
  0x36   : > { %p3784_p8 = pnand %p3783_p7, %p3782_p6 }
  0x37   : > { %p3789_p0 = por %p3788_p11, %p3787_p10 }
  0x38   : > { %p3785_p9 = pneg %p3784_p8 }
  0x3a   : > { %p3790_p2 = pnand %p3789_p0, %p3785_p9 }
  0x3c   : > { %3793 = shalt.err (!%p3790_p2)
}
  0x3d   : > { %s3904_s1 = smov 1024   ;;  %s4596_s21 = smov 16  }
  0x3e   : > { %s4597_s18 = smov 256   ;;  %357 = sbr.rel (%p3980_p3) target bundleno = 677 (0x2a5), region = 52 }
  0x3f   : > { %3481 = dma.hbm_to_vmem [thread:$0]  (!%p4069_p5), %s344_s15, 16384, %s346_s9, %s334_s10, %s3904_s1, %s4597_s18, %s4596_s21  }
  0x43   : > { %3854 = dma.done.wait (%p196_p1), [#allocation3], 128  }
  0x44   : > { %3856 = vsyncadd (%p196_p1), [#allocation3], 4294967168 }
  0x45   : > { %3858 = dma.done.wait (%p196_p1), [#allocation6], 1056  }
  0x46   : > { %3860 = vsyncadd (%p196_p1), [#allocation6], 4294966240 }
  0x47   : > { %3862 = dma.done.wait (%p196_p1), [#allocation9], 8224  }
  0x48   : > { %3864 = vsyncadd (%p196_p1), [#allocation9], 4294959072 }
  0x49   : > { %3866 = dma.done.wait (%p196_p1), [#allocation12], 128  }
  0x4a   : > { %3868 = vsyncadd (%p196_p1), [#allocation12], 4294967168  ;;  %s4104_s0 = sand.u32 1, %s3883_s28  }
  0x4b   : > { %s2413_s2 = sshll.u32 %s4104_s0, 10  ;;  %s395_s13 = scalar_lea.sflag [#allocation15], %s4104_s0 }
  0x4c   : > { %s4108_s9 = scalar_lea.vmem [#allocation14], %s2413_s2 }
  0x4d   : > { %3870 = dma.done.wait (%p4049_p12), %s395_s13, 16384  }
  0x4e   : > { %3872 = vsyncadd (%p4049_p12), %s395_s13, 4294950912  ;;  %v2441_v0 = vld [vmem:[#allocation5 + $0x30] sm:$0xf]  ;;  %v3230_v1 = vld [vmem:[#allocation5 + $0x34] sm:$0xf0]  ;;  %vm485_vm0 = vcmask 523264  }
  0x4f   : > { %v3229_v2 = vld [vmem:[#allocation5 + $0x34] sm:$0xf]  ;;  %v2442_v3 = vor.u32 %v3230_v1, %v2441_v0  ;;  %v2443_v4 = vld [vmem:[#allocation5 + $0x38] sm:$0xf0]  ;;  %v2433_v5 = vld [vmem:[#allocation5 + $0x20] sm:$0xf] }
  0x50   : > { %v3228_v6 = vld [vmem:[#allocation5 + $0x24] sm:$0xf0]  ;;  %v2446_v7 = vor.u32 %v3229_v2, %v2443_v4  ;;  %v3227_v8 = vld [vmem:[#allocation5 + $0x24] sm:$0xf]  ;;  %v2435_v9 = vld [vmem:[#allocation5 + $0x28] sm:$0xf0] }
  0x51   : > { %493 = vmatpush.bf16.msra.mxu0 %v2442_v3  ;;  %v2434_v10 = vor.u32 %v3228_v6, %v2433_v5  ;;  %v2438_v11 = vor.u32 %v3227_v8, %v2435_v9  ;;  %v2425_v12 = vld [vmem:[#allocation5 + $0x10] sm:$0xf]  ;;  %v3226_v13 = vld [vmem:[#allocation5 + $0x14] sm:$0xf0]  ;;  %v3225_v14 = vld [vmem:[#allocation5 + $0x14] sm:$0xf] }
  0x52   : > { %506 = vmatpush.bf16.msra.mxu1 %v2446_v7  ;;  %v2427_v15 = vld [vmem:[#allocation5 + $0x18] sm:$0xf0]  ;;  %v2426_v16 = vor.u32 %v3226_v13, %v2425_v12  ;;  %v2417_v18 = vld [vmem:[#allocation5] sm:$0xf]  ;;  %v3224_v19 = vld [vmem:[#allocation5 + $0x4] sm:$0xf0] }
  0x53   : > { %v2430_v17 = vor.u32 %v3225_v14, %v2427_v15  ;;  %v3223_v20 = vld [vmem:[#allocation5 + $0x4] sm:$0xf]  ;;  %v2419_v21 = vld [vmem:[#allocation5 + $0x8] sm:$0xf0]  ;;  %v2418_v22 = vor.u32 %v3224_v19, %v2417_v18  ;;  %v435_v23 = vld [vmem:[#allocation2] sm:$0xff]  ;;  %v3905_v57 = vmov 8.0  }
  0x54   : > { %v2422_v24 = vor.u32 %v3223_v20, %v2419_v21  ;;  %v436_v25 = vpack.c.bf16 %v435_v23, %v435_v23  ;;  %v2563_v26 = vld [vmem:[#allocation10 + $0xe0] sm:$0xf]  ;;  %v3261_v27 = vld [vmem:[#allocation10 + $0xec] sm:$0xf0]  ;;  %v3259_v31 = vld [vmem:[#allocation10 + $0xe4] sm:$0xf]  ;;  %3547 = vrcp.f32 %v3905_v57 }
  0x55   : > { %494 = vmatpush.bf16.msra.mxu0 %v2434_v10  ;;  %v2564_v28 = vor.u32 %v3261_v27, %v2563_v26  ;;  %v2691_v29 = vld [vmem:[#allocation10 + $0x1e0] sm:$0xf]  ;;  %v3293_v30 = vld [vmem:[#allocation10 + $0x1ec] sm:$0xf0]  ;;  %v2565_v33 = vld [vmem:[#allocation10 + $0xf0] sm:$0xf0] }
  0x56   : > { %507 = vmatpush.bf16.msra.mxu1 %v2438_v11  ;;  %v2692_v32 = vor.u32 %v3293_v30, %v2691_v29  ;;  %v3291_v34 = vld [vmem:[#allocation10 + $0x1e4] sm:$0xf]  ;;  %v2568_v35 = vor.u32 %v3259_v31, %v2565_v33  ;;  %v2693_v36 = vld [vmem:[#allocation10 + $0x1f0] sm:$0xf0]  ;;  %v2547_v38 = vld [vmem:[#allocation10 + $0xc0] sm:$0xf] }
  0x57   : > { %988 = vmatpush.bf16.msra.mxu2 %v2564_v28  ;;  %v2696_v37 = vor.u32 %v3291_v34, %v2693_v36  ;;  %v3257_v39 = vld [vmem:[#allocation10 + $0xcc] sm:$0xf0]  ;;  %v2675_v40 = vld [vmem:[#allocation10 + $0x1c0] sm:$0xf]  ;;  %v3255_v43 = vld [vmem:[#allocation10 + $0xc4] sm:$0xf] }
  0x58   : > { %1001 = vmatpush.bf16.msra.mxu3 %v2692_v32  ;;  %v2548_v41 = vor.u32 %v3257_v39, %v2547_v38  ;;  %v3289_v42 = vld [vmem:[#allocation10 + $0x1cc] sm:$0xf0]  ;;  %v2549_v44 = vld [vmem:[#allocation10 + $0xd0] sm:$0xf0]  ;;  %v3287_v47 = vld [vmem:[#allocation10 + $0x1c4] sm:$0xf] }
  0x59   : > { %495 = vmatpush.bf16.msra.mxu0 %v2426_v16  ;;  %v2676_v45 = vor.u32 %v3289_v42, %v2675_v40  ;;  %v2552_v46 = vor.u32 %v3255_v43, %v2549_v44  ;;  %v2677_v48 = vld [vmem:[#allocation10 + $0x1d0] sm:$0xf0]  ;;  %v2531_v50 = vld [vmem:[#allocation10 + $0xa0] sm:$0xf]  ;;  %v3253_v51 = vld [vmem:[#allocation10 + $0xac] sm:$0xf0] }
  0x5a   : > { %508 = vmatpush.bf16.msra.mxu1 %v2430_v17  ;;  %v2680_v49 = vor.u32 %v3287_v47, %v2677_v48  ;;  %v2659_v52 = vld [vmem:[#allocation10 + $0x1a0] sm:$0xf]  ;;  %v2532_v53 = vor.u32 %v3253_v51, %v2531_v50  ;;  %v3285_v54 = vld [vmem:[#allocation10 + $0x1ac] sm:$0xf0]  ;;  %v3251_v55 = vld [vmem:[#allocation10 + $0xa4] sm:$0xf]  ;;  %v4114_v11 = vpop.eup %3547 }
  0x5b   : > { %989 = vmatpush.bf16.msra.mxu2 %v2548_v41  ;;  %v2533_v56 = vld [vmem:[#allocation10 + $0xb0] sm:$0xf0]  ;;  %v2660_v58 = vor.u32 %v3285_v54, %v2659_v52  ;;  %v3283_v60 = vld [vmem:[#allocation10 + $0x1a4] sm:$0xf]  ;;  %v2515_v63 = vld [vmem:[#allocation10 + $0x80] sm:$0xf]  ;;  %vm534_vm1 = vweird.f32 %v4114_v11 }
  0x5c   : > { %1002 = vmatpush.bf16.msra.mxu3 %v2676_v45  ;;  %v2536_v59 = vor.u32 %v3251_v55, %v2533_v56  ;;  %v2661_v61 = vld [vmem:[#allocation10 + $0x1b0] sm:$0xf0]  ;;  %v3249_v0 = vld [vmem:[#allocation10 + $0x8c] sm:$0xf0]  ;;  %v2643_v1 = vld [vmem:[#allocation10 + $0x180] sm:$0xf] }
  0x5d   : > { %496 = vmatpush.bf16.msra.mxu0 %v2418_v22  ;;  %v2664_v62 = vor.u32 %v3283_v60, %v2661_v61  ;;  %v2516_v2 = vor.u32 %v3249_v0, %v2515_v63  ;;  %v3281_v3 = vld [vmem:[#allocation10 + $0x18c] sm:$0xf0]  ;;  %v3247_v4 = vld [vmem:[#allocation10 + $0x84] sm:$0xf]  ;;  %v2517_v5 = vld [vmem:[#allocation10 + $0x90] sm:$0xf0] }
  0x5e   : > { %509 = vmatpush.bf16.msra.mxu1 %v2422_v24  ;;  %v2644_v6 = vor.u32 %v3281_v3, %v2643_v1  ;;  %v2520_v7 = vor.u32 %v3247_v4, %v2517_v5  ;;  %v3279_v8 = vld [vmem:[#allocation10 + $0x184] sm:$0xf]  ;;  %v2645_v9 = vld [vmem:[#allocation10 + $0x190] sm:$0xf0]  ;;  %v2499_v12 = vld [vmem:[#allocation10 + $0x60] sm:$0xf] }
  0x5f   : > { %990 = vmatpush.bf16.msra.mxu2 %v2532_v53  ;;  %v2648_v10 = vor.u32 %v3279_v8, %v2645_v9  ;;  %v3245_v13 = vld [vmem:[#allocation10 + $0x6c] sm:$0xf0]  ;;  %v2627_v14 = vld [vmem:[#allocation10 + $0x160] sm:$0xf]  ;;  %v3243_v17 = vld [vmem:[#allocation10 + $0x64] sm:$0xf] }
  0x60   : > { %2447 = vmatmul.msk.bf16.vlgmr.msra.gmra.mxu0 %vm485_vm0, %v436_v25  ;;  %1003 = vmatpush.bf16.msra.mxu3 %v2660_v58  ;;  %v2500_v15 = vor.u32 %v3245_v13, %v2499_v12  ;;  %v3277_v16 = vld [vmem:[#allocation10 + $0x16c] sm:$0xf0]  ;;  %v2501_v18 = vld [vmem:[#allocation10 + $0x70] sm:$0xf0]  ;;  %v3275_v21 = vld [vmem:[#allocation10 + $0x164] sm:$0xf] }
  0x61   : > { %2448 = vmatmul.msk.bf16.vlgmr.msra.gmra.mxu1 %vm485_vm0, %v436_v25  ;;  %1014 = vmatpush.bf16.msrb.mxu0 %v2568_v35  ;;  %v2628_v19 = vor.u32 %v3277_v16, %v2627_v14  ;;  %v2504_v20 = vor.u32 %v3243_v17, %v2501_v18  ;;  %v2629_v22 = vld [vmem:[#allocation10 + $0x170] sm:$0xf0]  ;;  %v530_v23 = vmul.f32 8.0, %v4114_v11  ;;  %v2483_v25 = vld [vmem:[#allocation10 + $0x40] sm:$0xf]  ;;  %s2414_s10 = sshll.u32 %s4104_s0, 5 }
  0x62   : > { %1027 = vmatpush.bf16.msrb.mxu1 %v2696_v37  ;;  %v2632_v24 = vor.u32 %v3275_v21, %v2629_v22  ;;  %v3241_v26 = vld [vmem:[#allocation10 + $0x4c] sm:$0xf0]  ;;  %v2611_v27 = vld [vmem:[#allocation10 + $0x140] sm:$0xf]  ;;  %v3239_v30 = vld [vmem:[#allocation10 + $0x44] sm:$0xf] }
  0x63   : > { %991 = vmatpush.bf16.msra.mxu2 %v2516_v2  ;;  %v2484_v28 = vor.u32 %v3241_v26, %v2483_v25  ;;  %v3273_v29 = vld [vmem:[#allocation10 + $0x14c] sm:$0xf0]  ;;  %v2485_v31 = vld [vmem:[#allocation10 + $0x50] sm:$0xf0]  ;;  %v3271_v34 = vld [vmem:[#allocation10 + $0x144] sm:$0xf] }
  0x64   : > { %1004 = vmatpush.bf16.msra.mxu3 %v2644_v6  ;;  %v2612_v32 = vor.u32 %v3273_v29, %v2611_v27  ;;  %v2488_v33 = vor.u32 %v3239_v30, %v2485_v31  ;;  %v2613_v35 = vld [vmem:[#allocation10 + $0x150] sm:$0xf0]  ;;  %v531_v36 = vsub.f32 1.0, %v530_v23  ;;  %v2467_v38 = vld [vmem:[#allocation10 + $0x20] sm:$0xf]  ;;  %s4533_s19 = scalar_lea.vmem [#allocation16], %s2414_s10 }
  0x65   : > { %1015 = vmatpush.bf16.msrb.mxu0 %v2552_v46  ;;  %v2616_v37 = vor.u32 %v3271_v34, %v2613_v35  ;;  %v3237_v39 = vld [vmem:[#allocation10 + $0x2c] sm:$0xf0]  ;;  %v2595_v40 = vld [vmem:[#allocation10 + $0x120] sm:$0xf]  ;;  %v3235_v43 = vld [vmem:[#allocation10 + $0x24] sm:$0xf] }
  0x66   : > { %1028 = vmatpush.bf16.msrb.mxu1 %v2680_v49  ;;  %v2468_v41 = vor.u32 %v3237_v39, %v2467_v38  ;;  %v3269_v42 = vld [vmem:[#allocation10 + $0x12c] sm:$0xf0]  ;;  %v2469_v44 = vld [vmem:[#allocation10 + $0x30] sm:$0xf0]  ;;  %v3267_v47 = vld [vmem:[#allocation10 + $0x124] sm:$0xf]  ;;  %v532_v56 = vmul.f32 %v4114_v11, %v531_v36 }
  0x67   : > { %992 = vmatpush.bf16.msra.mxu2 %v2500_v15  ;;  %v2596_v45 = vor.u32 %v3269_v42, %v2595_v40  ;;  %v2472_v46 = vor.u32 %v3235_v43, %v2469_v44  ;;  %v2597_v48 = vld [vmem:[#allocation10 + $0x130] sm:$0xf0]  ;;  %v2451_v54 = vld [vmem:[#allocation10] sm:$0xf]  ;;  %v3233_v55 = vld [vmem:[#allocation10 + $0xc] sm:$0xf0] }
  0x68   : > { %1005 = vmatpush.bf16.msra.mxu3 %v2628_v19  ;;  %v2600_v50 = vor.u32 %v3267_v47, %v2597_v48  ;;  %v2579_v60 = vld [vmem:[#allocation10 + $0x100] sm:$0xf]  ;;  %v3265_v61 = vld [vmem:[#allocation10 + $0x10c] sm:$0xf0]  ;;  %v3231_v1 = vld [vmem:[#allocation10 + $0x4] sm:$0xf]  ;;  %v533_v14 = vadd.f32 %v4114_v11, %v532_v56 }
  0x69   : > { %1016 = vmatpush.bf16.msrb.mxu0 %v2536_v59  ;;  %v2452_v59 = vor.u32 %v3233_v55, %v2451_v54  ;;  %v2580_v0 = vor.u32 %v3265_v61, %v2579_v60  ;;  %v2453_v2 = vld [vmem:[#allocation10 + $0x10] sm:$0xf0]  ;;  %v3263_v6 = vld [vmem:[#allocation10 + $0x104] sm:$0xf]  ;;  %v2571_v12 = vld [vmem:[#allocation10 + $0xe8] sm:$0xf] }
  0x6a   : > { %1029 = vmatpush.bf16.msrb.mxu1 %v2664_v62  ;;  %v2456_v5 = vor.u32 %v3231_v1, %v2453_v2  ;;  %v3262_v13 = vld [vmem:[#allocation10 + $0xf4] sm:$0xf0]  ;;  %v2699_v18 = vld [vmem:[#allocation10 + $0x1e8] sm:$0xf]  ;;  %v3260_v23 = vld [vmem:[#allocation10 + $0xec] sm:$0xf] }
  0x6b   : > { %993 = vmatpush.bf16.msra.mxu2 %v2484_v28  ;;  %v2572_v17 = vor.u32 %v3262_v13, %v2571_v12  ;;  %v3294_v19 = vld [vmem:[#allocation10 + $0x1f4] sm:$0xf0]  ;;  %v3292_v29 = vld [vmem:[#allocation10 + $0x1ec] sm:$0xf]  ;;  %v2701_v30 = vld [vmem:[#allocation10 + $0x1f8] sm:$0xf0] }
  0x6c   : > { %1006 = vmatpush.bf16.msra.mxu3 %v2612_v32  ;;  %v2700_v22 = vor.u32 %v3294_v19, %v2699_v18  ;;  %v2704_v34 = vor.u32 %v3292_v29, %v2701_v30  ;;  %v2555_v35 = vld [vmem:[#allocation10 + $0xc8] sm:$0xf]  ;;  %v3258_v36 = vld [vmem:[#allocation10 + $0xd4] sm:$0xf0]  ;;  %v2557_v47 = vld [vmem:[#allocation10 + $0xd8] sm:$0xf0] }
  0x6d   : > { %1017 = vmatpush.bf16.msrb.mxu0 %v2520_v7  ;;  %v2581_v7 = vld [vmem:[#allocation10 + $0x110] sm:$0xf0]  ;;  %v2556_v40 = vor.u32 %v3258_v36, %v2555_v35  ;;  %v3290_v42 = vld [vmem:[#allocation10 + $0x1d4] sm:$0xf0]  ;;  %v2685_v54 = vld [vmem:[#allocation10 + $0x1d8] sm:$0xf0] }
  0x6e   : > { %1030 = vmatpush.bf16.msrb.mxu1 %v2648_v10  ;;  %v2584_v10 = vor.u32 %v3263_v6, %v2581_v7  ;;  %v2541_v1 = vld [vmem:[#allocation10 + $0xb8] sm:$0xf0]  ;;  %v2523_v7 = vld [vmem:[#allocation10 + $0x88] sm:$0xf]  ;;  %v3250_v12 = vld [vmem:[#allocation10 + $0x94] sm:$0xf0] }
  0x6f   : > { %994 = vmatpush.bf16.msra.mxu2 %v2468_v41  ;;  %v2683_v41 = vld [vmem:[#allocation10 + $0x1c8] sm:$0xf]  ;;  %v2669_v6 = vld [vmem:[#allocation10 + $0x1b8] sm:$0xf0]  ;;  %v3248_v19 = vld [vmem:[#allocation10 + $0x8c] sm:$0xf] }
  0x70   : > { %1007 = vmatpush.bf16.msra.mxu3 %v2596_v45  ;;  %v2684_v45 = vor.u32 %v3290_v42, %v2683_v41  ;;  %v2651_v13 = vld [vmem:[#allocation10 + $0x188] sm:$0xf]  ;;  %v3244_v35 = vld [vmem:[#allocation10 + $0x6c] sm:$0xf]  ;;  %v2509_v36 = vld [vmem:[#allocation10 + $0x78] sm:$0xf0] }
  0x71   : > { %1018 = vmatpush.bf16.msrb.mxu0 %v2504_v20  ;;  %v2637_v41 = vld [vmem:[#allocation10 + $0x178] sm:$0xf0]  ;;  %s3423_s15 = sshll.u32 %s3975_s12, 5  ;;  %s2250_s17 = sshll.u32 %s4533_s19, 4  ;;  %s2251_s17 = int_to_ptr.vmem [resolvable:$true] %s2250_s17 }
  0x72   : > { %1031 = vmatpush.bf16.msrb.mxu1 %v2632_v24  ;;  %v2573_v24 = vld [vmem:[#allocation10 + $0xf8] sm:$0xf0]  ;;  %s2248_s14 = scalar_lea.hbm %s4580_s8, %s3423_s15  ;;  %s2237_s25 = scalar_lea.sflag [#allocation4], %s4104_s0 }
  0x73   : > { %995 = vmatpush.bf16.msra.mxu2 %v2452_v59  ;;  %v2576_v28 = vor.u32 %v3260_v23, %v2573_v24  ;;  %v2667_v59 = vld [vmem:[#allocation10 + $0x1a8] sm:$0xf]  ;;  %v2653_v24 = vld [vmem:[#allocation10 + $0x198] sm:$0xf0]  ;;  %s2252_s20 = sshll.u32 %s2248_s14, 4  ;;  %s3829_s2 = scalar_lea.hbm %s4580_s8, 128  ;;  %s2253_s20 = int_to_ptr.hbm [resolvable:$true] %s2252_s20 }
  0x74   : > { %1008 = vmatpush.bf16.msra.mxu3 %v2580_v0  ;;  %v3252_v0 = vld [vmem:[#allocation10 + $0xac] sm:$0xf]  ;;  %s3823_s1 = sshra.s32 %s2253_s20, 4  ;;  %s3824_s1 = int_to_ptr.hbm [resolvable:$true] %s3823_s1 }
  0x75   : > { %1019 = vmatpush.bf16.msrb.mxu0 %v2488_v33  ;;  %s3825_s21 = scalar_lea.hbm %s3824_s1, 32  ;;  %p3830_p5 = scmp.lt.s32.totalorder %s3824_s1, %s4580_s8 }
  0x76   : > { %1032 = vmatpush.bf16.msrb.mxu1 %v2616_v37  ;;  %v4135_v37 = vsel %vm534_vm1, %v4114_v11, %v533_v14  ;;  %v3282_v14 = vld [vmem:[#allocation10 + $0x194] sm:$0xf0]  ;;  %p3826_p1 = scmp.ne.s32.totalorder %s3824_s1, %s3825_s21  ;;  %p3831_p6 = scmp.lt.s32.totalorder %s3829_s2, %s3825_s21 }
  0x77   : > { %1040 = vmatpush.bf16.msrb.mxu2 %v2572_v17  ;;  %v2524_v17 = vor.u32 %v3250_v12, %v2523_v7  ;;  %v2652_v18 = vor.u32 %v3282_v14, %v2651_v13  ;;  %v3266_v12 = vld [vmem:[#allocation10 + $0x114] sm:$0xf0] }
  0x78   : > { %1053 = vmatpush.bf16.msrb.mxu3 %v2700_v22  ;;  %p3827_p3 = pnand %p3826_p1, %p4053_p13  ;;  %p3832_p7 = por %p3831_p6, %p3830_p5 }
  0x79   : > { %1020 = vmatpush.bf16.msrb.mxu0 %v2472_v46  ;;  %v3256_v46 = vld [vmem:[#allocation10 + $0xcc] sm:$0xf] }
  0x7a   : > { %1033 = vmatpush.bf16.msrb.mxu1 %v2600_v50  ;;  %p3828_p12 = pneg %p3827_p3 }
  0x7b   : > { %1041 = vmatpush.bf16.msrb.mxu2 %v2556_v40  ;;  %v3276_v40 = vld [vmem:[#allocation10 + $0x16c] sm:$0xf] }
  0x7c   : > { %1054 = vmatpush.bf16.msrb.mxu3 %v2684_v45  ;;  %v2640_v42 = vor.u32 %v3276_v40, %v2637_v41  ;;  %v2619_v45 = vld [vmem:[#allocation10 + $0x148] sm:$0xf]  ;;  %p3833_p8 = pnand %p3832_p7, %p3828_p12 }
  0x7d   : > { %1021 = vmatpush.bf16.msrb.mxu0 %v2456_v5  ;;  %v3284_v5 = vld [vmem:[#allocation10 + $0x1ac] sm:$0xf] }
  0x7e   : > { %1034 = vmatpush.bf16.msrb.mxu1 %v2584_v10  ;;  %v2544_v10 = vor.u32 %v3252_v0, %v2541_v1  ;;  %v3268_v1 = vld [vmem:[#allocation10 + $0x12c] sm:$0xf] }
  0x81   : > { %1066 = vmatpush.bf16.msra.mxu0 %v2576_v28  ;;  %v3246_v28 = vld [vmem:[#allocation10 + $0x74] sm:$0xf0] }
  0x82   : > { %1079 = vmatpush.bf16.msra.mxu1 %v2704_v34 }
  0xdd   : > { %v4117_v49 = vpop.f32.mrf.mxu0 }
  0xde   : > { %v517_v51 = vrot.slane %v4117_v49, 4  ;;  %v538_v52 = vmul.f32 %v4117_v49, %v4117_v49  ;;  %v4122_v53 = vpop.f32.mrf.mxu1 }
  0xdf   : > { %v523_v57 = vrot.slane %v4122_v53, 4  ;;  %v539_v58 = vmul.f32 %v4122_v53, %v4122_v53 }
  0xe0   : > { %v518_v62 = vadd.f32 %v517_v51, %v4117_v49  ;;  %v540_v63 = vrot.slane %v538_v52, 4  ;;  %v2560_v51 = vor.u32 %v3256_v46, %v2557_v47  ;;  %v3274_v47 = vld [vmem:[#allocation10 + $0x154] sm:$0xf0] }
  0xe1   : > { %v524_v3 = vadd.f32 %v523_v57, %v4122_v53  ;;  %v546_v4 = vrot.slane %v539_v58, 4  ;;  %v2539_v57 = vld [vmem:[#allocation10 + $0xa8] sm:$0xf] }
  0xe2   : > { %v519_v8 = vrot.slane %v518_v62, 2  ;;  %v541_v9 = vadd.f32 %v540_v63, %v538_v52  ;;  %v3288_v52 = vld [vmem:[#allocation10 + $0x1cc] sm:$0xf]  ;;  %1067 = vmatpush.bf16.msra.mxu0 %v2560_v51  ;;  %v3286_v63 = vld [vmem:[#allocation10 + $0x1b4] sm:$0xf0]  ;;  %v2620_v51 = vor.u32 %v3274_v47, %v2619_v45 }
  0xe3   : > { %v525_v15 = vrot.slane %v524_v3, 2  ;;  %v547_v16 = vadd.f32 %v546_v4, %v539_v58  ;;  %v2688_v56 = vor.u32 %v3288_v52, %v2685_v54  ;;  %v3254_v58 = vld [vmem:[#allocation10 + $0xb4] sm:$0xf0]  ;;  %v2668_v4 = vor.u32 %v3286_v63, %v2667_v59  ;;  %v3272_v52 = vld [vmem:[#allocation10 + $0x14c] sm:$0xf] }
  0xe4   : > { %v520_v20 = vadd.f32 %v519_v8, %v518_v62  ;;  %v542_v21 = vrot.slane %v541_v9, 2  ;;  %v2540_v62 = vor.u32 %v3254_v58, %v2539_v57  ;;  %v2621_v54 = vld [vmem:[#allocation10 + $0x158] sm:$0xf0]  ;;  %v3238_v57 = vld [vmem:[#allocation10 + $0x34] sm:$0xf0] }
  0xe5   : > { %v526_v25 = vadd.f32 %v525_v15, %v524_v3  ;;  %v548_v26 = vrot.slane %v547_v16, 2  ;;  %v500_v27 = vpop.f32.mrf.mxu0  ;;  %1080 = vmatpush.bf16.msra.mxu1 %v2688_v56  ;;  %1055 = vmatpush.bf16.msrb.mxu3 %v2668_v4  ;;  %v2603_v58 = vld [vmem:[#allocation10 + $0x128] sm:$0xf]  ;;  %v3270_v59 = vld [vmem:[#allocation10 + $0x134] sm:$0xf0] }
  0xe6   : > { %v521_v31 = vrot.slane %v520_v20, 1  ;;  %v543_v32 = vadd.f32 %v542_v21, %v541_v9  ;;  %v513_v33 = vpop.f32.mrf.mxu1  ;;  %1042 = vmatpush.bf16.msrb.mxu2 %v2540_v62  ;;  %v3280_v21 = vld [vmem:[#allocation10 + $0x18c] sm:$0xf]  ;;  %1068 = vmatpush.bf16.msra.mxu0 %v2544_v10  ;;  %v2477_v63 = vld [vmem:[#allocation10 + $0x38] sm:$0xf0]  ;;  %v2604_v4 = vor.u32 %v3270_v59, %v2603_v58 }
  0xe7   : > { %v527_v38 = vrot.slane %v526_v25, 1  ;;  %v549_v39 = vadd.f32 %v548_v26, %v547_v16  ;;  %v2672_v16 = vor.u32 %v3284_v5, %v2669_v6  ;;  %v2656_v27 = vor.u32 %v3280_v21, %v2653_v24  ;;  %v3236_v62 = vld [vmem:[#allocation10 + $0x2c] sm:$0xf]  ;;  %v2459_v5 = vld [vmem:[#allocation10 + $0x8] sm:$0xf] }
  0xe8   : > { %v522_v43 = vadd.f32 %v521_v31, %v520_v20  ;;  %v544_v44 = vrot.slane %v543_v32, 1  ;;  %v2525_v20 = vld [vmem:[#allocation10 + $0x98] sm:$0xf0]  ;;  %v2635_v31 = vld [vmem:[#allocation10 + $0x168] sm:$0xf] }
  0xe9   : > { %v528_v48 = vadd.f32 %v527_v38, %v526_v25  ;;  %v550_v50 = vrot.slane %v549_v39, 1  ;;  %v2528_v23 = vor.u32 %v3248_v19, %v2525_v20  ;;  %v2507_v25 = vld [vmem:[#allocation10 + $0x68] sm:$0xf]  ;;  %1081 = vmatpush.bf16.msra.mxu1 %v2672_v16  ;;  %1056 = vmatpush.bf16.msrb.mxu3 %v2652_v18  ;;  %v3234_v6 = vld [vmem:[#allocation10 + $0x14] sm:$0xf0] }
  0xea   : > { %v4138_v11 = vmul.f32 %v4135_v37, %v522_v43  ;;  %v545_v55 = vadd.f32 %v544_v44, %v543_v32  ;;  %1043 = vmatpush.bf16.msrb.mxu2 %v2524_v17  ;;  %v2508_v30 = vor.u32 %v3246_v28, %v2507_v25  ;;  %v3278_v32 = vld [vmem:[#allocation10 + $0x174] sm:$0xf0]  ;;  %v2491_v43 = vld [vmem:[#allocation10 + $0x48] sm:$0xf]  ;;  %v2461_v16 = vld [vmem:[#allocation10 + $0x18] sm:$0xf0]  ;;  %v2460_v18 = vor.u32 %v3234_v6, %v2459_v5 }
  0xeb   : > { %v4141_v60 = vmul.f32 %v4135_v37, %v528_v48  ;;  %v551_v61 = vadd.f32 %v550_v50, %v549_v39  ;;  %v2636_v34 = vor.u32 %v3278_v32, %v2635_v31  ;;  %1069 = vmatpush.bf16.msra.mxu0 %v2528_v23  ;;  %v2512_v39 = vor.u32 %v3244_v35, %v2509_v36  ;;  %v3242_v44 = vld [vmem:[#allocation10 + $0x54] sm:$0xf0]  ;;  %v3240_v48 = vld [vmem:[#allocation10 + $0x4c] sm:$0xf]  ;;  %v2493_v50 = vld [vmem:[#allocation10 + $0x58] sm:$0xf0] }
  0xec   : > { %v552_v2 = vmul.f32 %v545_v55, %v4135_v37  ;;  %v554_v3 = vmul.f32 %v4138_v11, %v4138_v11  ;;  %v2492_v46 = vor.u32 %v3242_v44, %v2491_v43  ;;  %v2475_v55 = vld [vmem:[#allocation10 + $0x28] sm:$0xf]  ;;  %v2496_v56 = vor.u32 %v3240_v48, %v2493_v50  ;;  %v3264_v19 = vld [vmem:[#allocation10 + $0x10c] sm:$0xf]  ;;  %v2589_v20 = vld [vmem:[#allocation10 + $0x118] sm:$0xf0] }
  0xed   : > { %v553_v8 = vmul.f32 %v551_v61, %v4135_v37  ;;  %v555_v9 = vmul.f32 %v4141_v60, %v4141_v60  ;;  %1082 = vmatpush.bf16.msra.mxu1 %v2656_v27  ;;  %1057 = vmatpush.bf16.msrb.mxu3 %v2636_v34  ;;  %v2624_v61 = vor.u32 %v3272_v52, %v2621_v54  ;;  %v2587_v10 = vld [vmem:[#allocation10 + $0x108] sm:$0xf]  ;;  %v515_v27 = vld [vmem:[#allocation7] sm:$0x3]  ;;  %v516_v31 = vld [vmem:[#allocation8] sm:$0x3] }
  0xee   : > { %v556_v15 = vsub.f32 %v552_v2, %v554_v3  ;;  %1044 = vmatpush.bf16.msrb.mxu2 %v2508_v30  ;;  %v2476_v0 = vor.u32 %v3238_v57, %v2475_v55  ;;  %v2605_v2 = vld [vmem:[#allocation10 + $0x138] sm:$0xf0]  ;;  %v560_v32 = vsub.f32 %v4117_v49, %v4138_v11  ;;  %v587_v34 = vperm.slane %v515_v27, 0  ;;  %v3357_v47 = vld [vmem:[%s4108_s9 + $0x1ec] sm:$0xf0] }
  0xef   : > { %v557_v22 = vsub.f32 %v553_v8, %v555_v9  ;;  %1070 = vmatpush.bf16.msra.mxu0 %v2512_v39  ;;  %v2480_v9 = vor.u32 %v3236_v62, %v2477_v63  ;;  %v2608_v14 = vor.u32 %v3268_v1, %v2605_v2  ;;  %v561_v39 = vsub.f32 %v4122_v53, %v4141_v60  ;;  %v2931_v52 = vld [vmem:[%s4108_s9 + $0x1c0] sm:$0xf]  ;;  %v3353_v54 = vld [vmem:[%s4108_s9 + $0x1cc] sm:$0xf0] }
  0xf0   : > { %v558_v26 = vmax.f32 %v556_v15, 0.0  ;;  %v3232_v15 = vld [vmem:[#allocation10 + $0xc] sm:$0xf]  ;;  %v588_v40 = vperm.slane %v515_v27, 1  ;;  %v595_v11 = vperm.slane %v516_v31, 1  ;;  %v2932_v55 = vor.u32 %v3353_v54, %v2931_v52 }
  0xf1   : > { %v559_v29 = vmax.f32 %v557_v22, 0.0  ;;  %1083 = vmatpush.bf16.msra.mxu1 %v2640_v42  ;;  %1058 = vmatpush.bf16.msrb.mxu3 %v2620_v51  ;;  %v2588_v22 = vor.u32 %v3266_v12, %v2587_v10  ;;  %v2464_v24 = vor.u32 %v3232_v15, %v2461_v16  ;;  %v594_v42 = vperm.slane %v516_v31, 0  ;;  %v3325_v57 = vld [vmem:[%s4108_s9 + $0xec] sm:$0xf0]  ;;  %v2915_v59 = vld [vmem:[%s4108_s9 + $0x1a0] sm:$0xf] }
  0xf2   : > { %v4149_v33 = vadd.f32 1e-05, %v558_v26  ;;  %1045 = vmatpush.bf16.msrb.mxu2 %v2492_v46  ;;  %v2592_v26 = vor.u32 %v3264_v19, %v2589_v20  ;;  %v2803_v63 = vld [vmem:[%s4108_s9 + $0xc0] sm:$0xf]  ;;  %v3317_v6 = vld [vmem:[%s4108_s9 + $0xac] sm:$0xf0] }
  0xf3   : > { %v4151_v38 = vadd.f32 1e-05, %v559_v29  ;;  %1071 = vmatpush.bf16.msra.mxu0 %v2496_v56  ;;  %v2819_v56 = vld [vmem:[%s4108_s9 + $0xe0] sm:$0xf]  ;;  %v3313_v16 = vld [vmem:[%s4108_s9 + $0x8c] sm:$0xf0] }
  0xf4   : > { %3549 = vrsqrt.f32 %v4149_v33  ;;  %vm570_vm4 = vweird.f32 %v4149_v33  ;;  %v2820_v58 = vor.u32 %v3325_v57, %v2819_v56  ;;  %v2899_v2 = vld [vmem:[%s4108_s9 + $0x180] sm:$0xf]  ;;  %v3337_v19 = vld [vmem:[%s4108_s9 + $0x14c] sm:$0xf0] }
  0xf5   : > { %3551 = vrsqrt.f32 %v4151_v38  ;;  %1084 = vmatpush.bf16.msra.mxu1 %v2624_v61  ;;  %1059 = vmatpush.bf16.msrb.mxu3 %v2604_v4  ;;  %vm580_vm6 = vweird.f32 %v4151_v38  ;;  %v3349_v61 = vld [vmem:[%s4108_s9 + $0x1ac] sm:$0xf0]  ;;  %v2787_v5 = vld [vmem:[%s4108_s9 + $0xa0] sm:$0xf] }
  0xf6   : > { %1046 = vmatpush.bf16.msrb.mxu2 %v2476_v0  ;;  %v2916_v62 = vor.u32 %v3349_v61, %v2915_v59  ;;  %v3321_v0 = vld [vmem:[%s4108_s9 + $0xcc] sm:$0xf0]  ;;  %v3203_v10 = vld [vmem:[%s4108_s9 + $0x3e0] sm:$0xf]  ;;  %v3351_v59 = vld [vmem:[%s4108_s9 + $0x1c4] sm:$0xf] }
  0xf7   : > { %1072 = vmatpush.bf16.msra.mxu0 %v2480_v9  ;;  %v2804_v1 = vor.u32 %v3321_v0, %v2803_v63  ;;  %v3341_v9 = vld [vmem:[%s4108_s9 + $0x16c] sm:$0xf0]  ;;  %v2771_v15 = vld [vmem:[%s4108_s9 + $0x80] sm:$0xf]  ;;  %v2933_v61 = vld [vmem:[%s4108_s9 + $0x1d0] sm:$0xf0] }
  0xf8   : > { %v3187_v20 = vld [vmem:[%s4108_s9 + $0x3c0] sm:$0xf]  ;;  %v3333_v31 = vld [vmem:[%s4108_s9 + $0x12c] sm:$0xf0] }
  0xf9   : > { %1085 = vmatpush.bf16.msra.mxu1 %v2608_v14  ;;  %1060 = vmatpush.bf16.msrb.mxu3 %v2588_v22  ;;  %v3417_v22 = vld [vmem:[%s4108_s9 + $0x3cc] sm:$0xf0]  ;;  %v3139_v56 = vld [vmem:[%s4108_s9 + $0x360] sm:$0xf] }
  0xfa   : > { %v3550_v3 = vpop.eup %3549  ;;  %1047 = vmatpush.bf16.msrb.mxu2 %v2460_v18  ;;  %v2867_v18 = vld [vmem:[%s4108_s9 + $0x140] sm:$0xf]  ;;  %v3381_v54 = vld [vmem:[%s4108_s9 + $0x2ac] sm:$0xf0] }
  0xfb   : > { %v3552_v7 = vpop.eup %3551  ;;  %v565_v8 = vmul.f32 %v3550_v3, %v4149_v33  ;;  %vm571_vm2 = vweird.f32 %v3550_v3  ;;  %1073 = vmatpush.bf16.msra.mxu0 %v2464_v24  ;;  %v2755_v24 = vld [vmem:[%s4108_s9 + $0x60] sm:$0xf]  ;;  %v3405_v57 = vld [vmem:[%s4108_s9 + $0x36c] sm:$0xf0] }
  0xfc   : > { %v575_v13 = vmul.f32 %v3552_v7, %v4151_v38  ;;  %vm581_vm3 = vweird.f32 %v3552_v7  ;;  %vm572_vm5 = vmor %vm570_vm4, %vm571_vm2  ;;  %v2947_v38 = vld [vmem:[%s4108_s9 + $0x1e0] sm:$0xf]  ;;  %v3297_v0 = vld [vmem:[%s4108_s9 + $0xc] sm:$0xf0] }
  0xfd   : > { %v566_v17 = vmul.f32 %v3550_v3, %v565_v8  ;;  %1086 = vmatpush.bf16.msra.mxu1 %v2592_v26  ;;  %vm582_vm7 = vmor %vm580_vm6, %vm581_vm3  ;;  %v2948_v53 = vor.u32 %v3357_v47, %v2947_v38  ;;  %v2883_v8 = vld [vmem:[%s4108_s9 + $0x160] sm:$0xf]  ;;  %v3355_v38 = vld [vmem:[%s4108_s9 + $0x1e4] sm:$0xf] }
  0xfe   : > { %v576_v21 = vmul.f32 %v3552_v7, %v575_v13  ;;  %v2884_v12 = vor.u32 %v3341_v9, %v2883_v8  ;;  %v3421_v13 = vld [vmem:[%s4108_s9 + $0x3ec] sm:$0xf0]  ;;  %v3075_v26 = vld [vmem:[%s4108_s9 + $0x2e0] sm:$0xf]  ;;  %v2949_v47 = vld [vmem:[%s4108_s9 + $0x1f0] sm:$0xf0] }
  0xff   : > { %v567_v23 = vmul.f32 0.5, %v566_v17  ;;  %v3204_v14 = vor.u32 %v3421_v13, %v3203_v10  ;;  %v2772_v17 = vor.u32 %v3313_v16, %v2771_v15  ;;  %v2707_v63 = vld [vmem:[%s4108_s9] sm:$0xf]  ;;  %v3401_v9 = vld [vmem:[%s4108_s9 + $0x34c] sm:$0xf0] }
 0x100   : > { %v577_v25 = vmul.f32 0.5, %v576_v21  ;;  %v2868_v21 = vor.u32 %v3337_v19, %v2867_v18  ;;  %v3123_v8 = vld [vmem:[%s4108_s9 + $0x340] sm:$0xf]  ;;  %v3347_v13 = vld [vmem:[%s4108_s9 + $0x1a4] sm:$0xf] }
 0x101   : > { %v568_v28 = vsub.f32 1.5, %v567_v23  ;;  %v3188_v23 = vor.u32 %v3417_v22, %v3187_v20  ;;  %v3373_v18 = vld [vmem:[%s4108_s9 + $0x26c] sm:$0xf0]  ;;  %v2805_v22 = vld [vmem:[%s4108_s9 + $0xd0] sm:$0xf0] }
 0x102   : > { %v578_v29 = vsub.f32 1.5, %v577_v25  ;;  %v3309_v25 = vld [vmem:[%s4108_s9 + $0x6c] sm:$0xf0] }
 0x103   : > { %v569_v30 = vmul.f32 %v3550_v3, %v568_v28  ;;  %v2756_v27 = vor.u32 %v3309_v25, %v2755_v24  ;;  %v3389_v28 = vld [vmem:[%s4108_s9 + $0x2ec] sm:$0xf0]  ;;  %v3107_v24 = vld [vmem:[%s4108_s9 + $0x320] sm:$0xf] }
 0x104   : > { %v579_v35 = vmul.f32 %v3552_v7, %v578_v29  ;;  %v3076_v29 = vor.u32 %v3389_v28, %v3075_v26  ;;  %v3397_v25 = vld [vmem:[%s4108_s9 + $0x32c] sm:$0xf0] }
 0x105   : > { %v573_v36 = vsel %vm572_vm5, %v3550_v3, %v569_v30  ;;  %v3345_v3 = vld [vmem:[%s4108_s9 + $0x18c] sm:$0xf0]  ;;  %v2851_v30 = vld [vmem:[%s4108_s9 + $0x120] sm:$0xf]  ;;  %v3108_v28 = vor.u32 %v3397_v25, %v3107_v24  ;;  %v2757_v24 = vld [vmem:[%s4108_s9 + $0x70] sm:$0xf0] }
 0x106   : > { %v584_v33 = vmul.f32 %v573_v36, %v560_v32  ;;  %v583_v41 = vsel %vm582_vm7, %v3552_v7, %v579_v35  ;;  %v2900_v4 = vor.u32 %v3345_v3, %v2899_v2  ;;  %v2788_v7 = vor.u32 %v3317_v6, %v2787_v5  ;;  %v3171_v32 = vld [vmem:[%s4108_s9 + $0x3a0] sm:$0xf]  ;;  %v3413_v35 = vld [vmem:[%s4108_s9 + $0x3ac] sm:$0xf0]  ;;  %v2821_v5 = vld [vmem:[%s4108_s9 + $0xf0] sm:$0xf0] }
 0x107   : > { %v585_v49 = vmul.f32 %v583_v41, %v561_v39  ;;  %v3172_v36 = vor.u32 %v3413_v35, %v3171_v32  ;;  %v2739_v39 = vld [vmem:[%s4108_s9 + $0x40] sm:$0xf]  ;;  %v2708_v2 = vor.u32 %v3297_v0, %v2707_v63  ;;  %v3377_v3 = vld [vmem:[%s4108_s9 + $0x28c] sm:$0xf0]  ;;  %v2773_v0 = vld [vmem:[%s4108_s9 + $0x90] sm:$0xf0] }
 0x108   : > { %v591_v43 = vmul.f32 %v587_v34, %v584_v33  ;;  %v2852_v34 = vor.u32 %v3333_v31, %v2851_v30  ;;  %v3059_v33 = vld [vmem:[%s4108_s9 + $0x2c0] sm:$0xf]  ;;  %v2901_v30 = vld [vmem:[%s4108_s9 + $0x190] sm:$0xf0]  ;;  %v3387_v25 = vld [vmem:[%s4108_s9 + $0x2e4] sm:$0xf] }
 0x109   : > { %v592_v44 = vmul.f32 %v588_v40, %v585_v49  ;;  %v3305_v40 = vld [vmem:[%s4108_s9 + $0x4c] sm:$0xf0]  ;;  %v2995_v32 = vld [vmem:[%s4108_s9 + $0x240] sm:$0xf] }
 0x10a   : > { %v598_v45 = vadd.f32 %v594_v42, %v591_v43  ;;  %v2740_v41 = vor.u32 %v3305_v40, %v2739_v39  ;;  %v3385_v42 = vld [vmem:[%s4108_s9 + $0x2cc] sm:$0xf0] }
 0x10b   : > { %v599_v46 = vadd.f32 %v595_v11, %v592_v44  ;;  %v3060_v49 = vor.u32 %v3385_v42, %v3059_v33  ;;  %v2835_v11 = vld [vmem:[%s4108_s9 + $0x100] sm:$0xf]  ;;  %v3329_v43 = vld [vmem:[%s4108_s9 + $0x10c] sm:$0xf0]  ;;  %v3315_v33 = vld [vmem:[%s4108_s9 + $0xa4] sm:$0xf] }
 0x10c   : > { %v600_v48 = vmax.f32 %v598_v45, 0.0  ;;  %v3155_v44 = vld [vmem:[%s4108_s9 + $0x380] sm:$0xf]  ;;  %v2836_v45 = vor.u32 %v3329_v43, %v2835_v11  ;;  %v3393_v43 = vld [vmem:[%s4108_s9 + $0x30c] sm:$0xf0] }
 0x10d   : > { %v601_v50 = vmax.f32 %v599_v46, 0.0  ;;  %v3409_v46 = vld [vmem:[%s4108_s9 + $0x38c] sm:$0xf0]  ;;  %v3091_v11 = vld [vmem:[%s4108_s9 + $0x300] sm:$0xf] }
 0x10e   : > { %v602_v51 = vpack.c.bf16 %v600_v48, %v600_v48  ;;  %v3156_v48 = vor.u32 %v3409_v46, %v3155_v44 }
 0x10f   : > { %v603_v60 = vpack.c.bf16 %v601_v50, %v601_v50  ;;  %v2952_v50 = vor.u32 %v3355_v38, %v2949_v47  ;;  %v3092_v47 = vor.u32 %v3393_v43, %v3091_v11  ;;  %v3303_v43 = vld [vmem:[%s4108_s9 + $0x44] sm:$0xf] }
 0x110   : > { %996 = vmatmul.bf16.vlgmr.msra.gmra.mxu2 %v602_v51  ;;  %1022 = vmatmul.bf16.vlgmr.msrb.gmra.mxu0 %v602_v51 }
 0x111   : > { %1009 = vmatmul.bf16.vlgmr.msra.gmra.mxu3 %v603_v60  ;;  %1035 = vmatmul.bf16.vlgmr.msrb.gmra.mxu1 %v603_v60 }
 0x112   : > { %2033 = vmatpush.bf16.msra.mxu3 %v2948_v53  ;;  %2020 = vmatpush.bf16.msra.mxu2 %v2820_v58  ;;  %v3301_v53 = vld [vmem:[%s4108_s9 + $0x2c] sm:$0xf0]  ;;  %v3140_v58 = vor.u32 %v3405_v57, %v3139_v56 }
 0x113   : > { %2059 = vmatpush.bf16.msrb.mxu1 %v3204_v14  ;;  %2046 = vmatpush.bf16.msrb.mxu0 %v3076_v29  ;;  %v2917_v14 = vld [vmem:[%s4108_s9 + $0x1b0] sm:$0xf0]  ;;  %v3343_v29 = vld [vmem:[%s4108_s9 + $0x184] sm:$0xf] }
 0x114   : > { %v2920_v16 = vor.u32 %v3347_v13, %v2917_v14  ;;  %v2904_v31 = vor.u32 %v3343_v29, %v2901_v30 }
 0x116   : > { %2034 = vmatpush.bf16.msra.mxu3 %v2932_v55  ;;  %2021 = vmatpush.bf16.msra.mxu2 %v2804_v1  ;;  %v3027_v1 = vld [vmem:[%s4108_s9 + $0x280] sm:$0xf] }
 0x117   : > { %2060 = vmatpush.bf16.msrb.mxu1 %v3188_v23  ;;  %2047 = vmatpush.bf16.msrb.mxu0 %v3060_v49  ;;  %v3028_v6 = vor.u32 %v3377_v3, %v3027_v1 }
 0x11a   : > { %2035 = vmatpush.bf16.msra.mxu3 %v2916_v62  ;;  %2022 = vmatpush.bf16.msra.mxu2 %v2788_v7  ;;  %v2936_v62 = vor.u32 %v3351_v59, %v2933_v61  ;;  %v3365_v59 = vld [vmem:[%s4108_s9 + $0x22c] sm:$0xf0]  ;;  %v3311_v61 = vld [vmem:[%s4108_s9 + $0x84] sm:$0xf] }
 0x11b   : > { %2061 = vmatpush.bf16.msrb.mxu1 %v3172_v36 }
 0x11e   : > { %2036 = vmatpush.bf16.msra.mxu3 %v2900_v4  ;;  %2023 = vmatpush.bf16.msra.mxu2 %v2772_v17  ;;  %v3323_v4 = vld [vmem:[%s4108_s9 + $0xe4] sm:$0xf]  ;;  %v3011_v17 = vld [vmem:[%s4108_s9 + $0x260] sm:$0xf] }
 0x11f   : > { %2062 = vmatpush.bf16.msrb.mxu1 %v3156_v48  ;;  %v2824_v7 = vor.u32 %v3323_v4, %v2821_v5  ;;  %v3012_v20 = vor.u32 %v3373_v18, %v3011_v17  ;;  %v3339_v48 = vld [vmem:[%s4108_s9 + $0x164] sm:$0xf]  ;;  %v3361_v18 = vld [vmem:[%s4108_s9 + $0x20c] sm:$0xf0] }
 0x120   : > { %1048 = vmatmul.bf16.vlgmr.msrb.gmra.mxu2 %v602_v51  ;;  %1074 = vmatmul.bf16.vlgmr.msra.gmra.mxu0 %v602_v51  ;;  %v2723_v51 = vld [vmem:[%s4108_s9 + $0x20] sm:$0xf]  ;;  %v3335_v5 = vld [vmem:[%s4108_s9 + $0x144] sm:$0xf] }
 0x121   : > { %1061 = vmatmul.bf16.vlgmr.msrb.gmra.mxu3 %v603_v60  ;;  %1087 = vmatmul.bf16.vlgmr.msra.gmra.mxu1 %v603_v60  ;;  %v3043_v60 = vld [vmem:[%s4108_s9 + $0x2a0] sm:$0xf]  ;;  %v2724_v52 = vor.u32 %v3301_v53, %v2723_v51 }
 0x122   : > { %2037 = vmatpush.bf16.msra.mxu3 %v2884_v12  ;;  %2024 = vmatpush.bf16.msra.mxu2 %v2756_v27  ;;  %v3044_v55 = vor.u32 %v3381_v54, %v3043_v60  ;;  %v3124_v12 = vor.u32 %v3401_v9, %v3123_v8  ;;  %v3419_v60 = vld [vmem:[%s4108_s9 + $0x3e4] sm:$0xf]  ;;  %v2979_v54 = vld [vmem:[%s4108_s9 + $0x220] sm:$0xf] }
 0x123   : > { %2063 = vmatpush.bf16.msrb.mxu1 %v3140_v58  ;;  %v2980_v63 = vor.u32 %v3365_v59, %v2979_v54  ;;  %v3415_v9 = vld [vmem:[%s4108_s9 + $0x3c4] sm:$0xf] }
 0x124   : > { %2048 = vmatpush.bf16.msrb.mxu0 %v3044_v55  ;;  %v3327_v54 = vld [vmem:[%s4108_s9 + $0x104] sm:$0xf] }
 0x126   : > { %2038 = vmatpush.bf16.msra.mxu3 %v2868_v21  ;;  %2025 = vmatpush.bf16.msra.mxu2 %v2740_v41  ;;  %v3319_v21 = vld [vmem:[%s4108_s9 + $0xc4] sm:$0xf]  ;;  %v2789_v41 = vld [vmem:[%s4108_s9 + $0xb0] sm:$0xf0] }
 0x127   : > { %2064 = vmatpush.bf16.msrb.mxu1 %v3124_v12  ;;  %v2808_v23 = vor.u32 %v3319_v21, %v2805_v22  ;;  %v2792_v49 = vor.u32 %v3315_v33, %v2789_v41  ;;  %v2963_v12 = vld [vmem:[%s4108_s9 + $0x200] sm:$0xf]  ;;  %v3411_v33 = vld [vmem:[%s4108_s9 + $0x3a4] sm:$0xf]  ;;  %v3173_v41 = vld [vmem:[%s4108_s9 + $0x3b0] sm:$0xf0] }
 0x128   : > { %2049 = vmatpush.bf16.msrb.mxu0 %v3028_v6  ;;  %v2869_v6 = vld [vmem:[%s4108_s9 + $0x150] sm:$0xf0] }
 0x129   : > { %v2872_v8 = vor.u32 %v3335_v5, %v2869_v6 }
 0x12a   : > { %2039 = vmatpush.bf16.msra.mxu3 %v2852_v34  ;;  %2026 = vmatpush.bf16.msra.mxu2 %v2724_v52  ;;  %v3369_v34 = vld [vmem:[%s4108_s9 + $0x24c] sm:$0xf0]  ;;  %v3205_v52 = vld [vmem:[%s4108_s9 + $0x3f0] sm:$0xf0] }
 0x12b   : > { %v2996_v40 = vor.u32 %v3369_v34, %v2995_v32  ;;  %2065 = vmatpush.bf16.msrb.mxu1 %v3108_v28  ;;  %v3331_v32 = vld [vmem:[%s4108_s9 + $0x124] sm:$0xf]  ;;  %v2853_v34 = vld [vmem:[%s4108_s9 + $0x130] sm:$0xf0] }
 0x12c   : > { %2050 = vmatpush.bf16.msrb.mxu0 %v3012_v20  ;;  %v3307_v20 = vld [vmem:[%s4108_s9 + $0x64] sm:$0xf] }
 0x12e   : > { %2040 = vmatpush.bf16.msra.mxu3 %v2836_v45  ;;  %2027 = vmatpush.bf16.msra.mxu2 %v2708_v2 }
 0x12f   : > { %2066 = vmatpush.bf16.msrb.mxu1 %v3092_v47  ;;  %v3176_v47 = vor.u32 %v3411_v33, %v3173_v41 }
 0x130   : > { %2051 = vmatpush.bf16.msrb.mxu0 %v2996_v40  ;;  %v2856_v40 = vor.u32 %v3331_v32, %v2853_v34  ;;  %v3375_v32 = vld [vmem:[%s4108_s9 + $0x284] sm:$0xf] }
 0x132   : > { %2085 = vmatpush.bf16.msrb.mxu3 %v2952_v50  ;;  %2072 = vmatpush.bf16.msrb.mxu2 %v2824_v7  ;;  %v2885_v50 = vld [vmem:[%s4108_s9 + $0x170] sm:$0xf0]  ;;  %v2776_v7 = vor.u32 %v3311_v61, %v2773_v0 }
 0x133   : > { %v2888_v53 = vor.u32 %v3339_v48, %v2885_v50  ;;  %v3383_v48 = vld [vmem:[%s4108_s9 + $0x2c4] sm:$0xf]  ;;  %v3061_v50 = vld [vmem:[%s4108_s9 + $0x2d0] sm:$0xf0] }
 0x134   : > { %2052 = vmatpush.bf16.msrb.mxu0 %v2980_v63 }
 0x136   : > { %2086 = vmatpush.bf16.msrb.mxu3 %v2936_v62  ;;  %2073 = vmatpush.bf16.msrb.mxu2 %v2808_v23  ;;  %v3208_v62 = vor.u32 %v3419_v60, %v3205_v52  ;;  %v2964_v23 = vor.u32 %v3361_v18, %v2963_v12  ;;  %v3064_v52 = vor.u32 %v3383_v48, %v3061_v50 }
 0x138   : > { %2111 = vmatpush.bf16.msra.mxu1 %v3208_v62  ;;  %2053 = vmatpush.bf16.msrb.mxu0 %v2964_v23  ;;  %v3157_v62 = vld [vmem:[%s4108_s9 + $0x390] sm:$0xf0] }
 0x13a   : > { %2087 = vmatpush.bf16.msrb.mxu3 %v2920_v16  ;;  %2074 = vmatpush.bf16.msrb.mxu2 %v2792_v49 }
 0x13e   : > { %2088 = vmatpush.bf16.msrb.mxu3 %v2904_v31  ;;  %2075 = vmatpush.bf16.msrb.mxu2 %v2776_v7  ;;  %v3299_v7 = vld [vmem:[%s4108_s9 + $0x24] sm:$0xf] }
 0x142   : > { %2089 = vmatpush.bf16.msrb.mxu3 %v2888_v53 }
 0x146   : > { %2090 = vmatpush.bf16.msrb.mxu3 %v2872_v8  ;;  %v2725_v8 = vld [vmem:[%s4108_s9 + $0x30] sm:$0xf0] }
 0x14a   : > { %2091 = vmatpush.bf16.msrb.mxu3 %v2856_v40  ;;  %v3029_v40 = vld [vmem:[%s4108_s9 + $0x290] sm:$0xf0] }
 0x18d   : > { %v1023_v10 = vpop.f32.mrf.mxu0 }
 0x18e   : > { %v1036_v15 = vpop.f32.mrf.mxu1 }
 0x18f   : > { %v4225_v19 = vadd.f32 %v1036_v15, %v1023_v10  ;;  %v3189_v10 = vld [vmem:[%s4108_s9 + $0x3d0] sm:$0xf0] }
 0x190   : > { %v3192_v22 = vor.u32 %v3415_v9, %v3189_v10 }
 0x191   : > { %v1100_v26 = vrot.slane %v4225_v19, 4  ;;  %v1123_v27 = vmul.f32 %v4225_v19, %v4225_v19 }
 0x192   : > { %2112 = vmatpush.bf16.msra.mxu1 %v3192_v22  ;;  %v3141_v22 = vld [vmem:[%s4108_s9 + $0x370] sm:$0xf0] }
 0x193   : > { %v1101_v35 = vadd.f32 %v1100_v26, %v4225_v19  ;;  %v1132_v36 = vrot.slane %v1123_v27, 4  ;;  %v997_v39 = vpop.f32.mrf.mxu2  ;;  %v3077_v26 = vld [vmem:[%s4108_s9 + $0x2f0] sm:$0xf0] }
 0x194   : > { %v1010_v42 = vpop.f32.mrf.mxu3 }
 0x195   : > { %v1102_v44 = vrot.slane %v1101_v35, 2  ;;  %v1133_v45 = vadd.f32 %v1132_v36, %v1123_v27  ;;  %v4243_v46 = vadd.f32 %v1010_v42, %v997_v39  ;;  %v1025_v38 = vpop.f32.mrf.mxu0  ;;  %v2760_v36 = vor.u32 %v3307_v20, %v2757_v24 }
 0x196   : > { %v1038_v51 = vpop.f32.mrf.mxu1  ;;  %v3080_v39 = vor.u32 %v3387_v25, %v3077_v26  ;;  %2113 = vmatpush.bf16.msra.mxu1 %v3176_v47  ;;  %v3295_v25 = vld [vmem:[%s4108_s9 + $0x4] sm:$0xf] }
 0x197   : > { %v1103_v55 = vadd.f32 %v1102_v44, %v1101_v35  ;;  %v1134_v56 = vrot.slane %v1133_v45, 2  ;;  %v1094_v57 = vrot.slane %v4243_v46, 4  ;;  %v1122_v58 = vmul.f32 %v4243_v46, %v4243_v46  ;;  %v2741_v44 = vld [vmem:[%s4108_s9 + $0x50] sm:$0xf0]  ;;  %2076 = vmatpush.bf16.msrb.mxu2 %v2760_v36  ;;  %v3399_v47 = vld [vmem:[%s4108_s9 + $0x344] sm:$0xf] }
 0x198   : > { %2098 = vmatpush.bf16.msra.mxu0 %v3080_v39  ;;  %v2744_v60 = vor.u32 %v3303_v43, %v2741_v44 }
 0x199   : > { %v1104_v1 = vrot.slane %v1103_v55, 1  ;;  %v1135_v2 = vadd.f32 %v1134_v56, %v1133_v45  ;;  %v1095_v3 = vadd.f32 %v1094_v57, %v4243_v46  ;;  %v1126_v4 = vrot.slane %v1122_v58, 4  ;;  %v3407_v56 = vld [vmem:[%s4108_s9 + $0x384] sm:$0xf] }
 0x19b   : > { %v1105_v13 = vadd.f32 %v1104_v1, %v1103_v55  ;;  %v1136_v14 = vrot.slane %v1135_v2, 1  ;;  %v1096_v15 = vrot.slane %v1095_v3, 2  ;;  %v1127_v16 = vadd.f32 %v1126_v4, %v1122_v58  ;;  %v999_v17 = vpop.f32.mrf.mxu2  ;;  %v2837_v55 = vld [vmem:[%s4108_s9 + $0x110] sm:$0xf0]  ;;  %2077 = vmatpush.bf16.msrb.mxu2 %v2744_v60 }
 0x19c   : > { %v1012_v21 = vpop.f32.mrf.mxu3  ;;  %v2840_v61 = vor.u32 %v3327_v54, %v2837_v55  ;;  %2099 = vmatpush.bf16.msra.mxu0 %v3064_v52  ;;  %v3125_v60 = vld [vmem:[%s4108_s9 + $0x350] sm:$0xf0] }
 0x19d   : > { %v4268_v27 = vmul.f32 %v1105_v13, %v4135_v37  ;;  %v1137_v28 = vadd.f32 %v1136_v14, %v1135_v2  ;;  %v1097_v29 = vadd.f32 %v1096_v15, %v1095_v3  ;;  %v1128_v30 = vrot.slane %v1127_v16, 2  ;;  %v1075_v31 = vpop.f32.mrf.mxu0  ;;  %v3379_v14 = vld [vmem:[%s4108_s9 + $0x2a4] sm:$0xf]  ;;  %v3045_v15 = vld [vmem:[%s4108_s9 + $0x2b0] sm:$0xf0] }
 0x19e   : > { %v1088_v35 = vpop.f32.mrf.mxu1  ;;  %v3160_v2 = vor.u32 %v3407_v56, %v3157_v62  ;;  %2092 = vmatpush.bf16.msrb.mxu3 %v2840_v61  ;;  %v3403_v21 = vld [vmem:[%s4108_s9 + $0x364] sm:$0xf]  ;;  %v3048_v36 = vor.u32 %v3379_v14, %v3045_v15 }
 0x19f   : > { %v1151_v42 = vmul.f32 %v1137_v28, %v4135_v37  ;;  %v1155_v49 = vmul.f32 %v4268_v27, %v4268_v27  ;;  %v1098_v11 = vrot.slane %v1097_v29, 1  ;;  %v1129_v45 = vadd.f32 %v1128_v30, %v1127_v16  ;;  %v3371_v56 = vld [vmem:[%s4108_s9 + $0x264] sm:$0xf] }
 0x1a0   : > { %v4279_v38 = vadd.f32 %v1088_v35, %v1075_v31  ;;  %2114 = vmatpush.bf16.msra.mxu1 %v3160_v2  ;;  %v2728_v30 = vor.u32 %v3299_v7, %v2725_v8  ;;  %v2709_v31 = vld [vmem:[%s4108_s9 + $0x10] sm:$0xf0]  ;;  %v3144_v39 = vor.u32 %v3403_v21, %v3141_v22  ;;  %2100 = vmatpush.bf16.msra.mxu0 %v3048_v36  ;;  %v3391_v21 = vld [vmem:[%s4108_s9 + $0x304] sm:$0xf]  ;;  %v4348_v36 = vld [vmem:[#allocation13] sm:$0xf] }
 0x1a1   : > { %v1159_v51 = vsub.f32 %v1151_v42, %v1155_v49  ;;  %v1099_v53 = vadd.f32 %v1098_v11, %v1097_v29  ;;  %v1130_v57 = vrot.slane %v1129_v45, 1  ;;  %v2712_v44 = vor.u32 %v3295_v25, %v2709_v31  ;;  %v3109_v2 = vld [vmem:[%s4108_s9 + $0x330] sm:$0xf0]  ;;  %v3363_v31 = vld [vmem:[%s4108_s9 + $0x224] sm:$0xf] }
 0x1a2   : > { %v1112_v58 = vrot.slane %v4279_v38, 4  ;;  %v1125_v59 = vmul.f32 %v4279_v38, %v4279_v38  ;;  %2078 = vmatpush.bf16.msrb.mxu2 %v2728_v30  ;;  %v2997_v7 = vld [vmem:[%s4108_s9 + $0x250] sm:$0xf0] }
 0x1a3   : > { %v1163_v63 = vmax.f32 %v1159_v51, 0.0  ;;  %v4291_v0 = vmul.f32 %v1099_v53, %v4135_v37  ;;  %v1049_v1 = vpop.f32.mrf.mxu2  ;;  %v1131_v3 = vadd.f32 %v1130_v57, %v1129_v45  ;;  %v3032_v45 = vor.u32 %v3375_v32, %v3029_v40  ;;  %v3013_v57 = vld [vmem:[%s4108_s9 + $0x270] sm:$0xf0] }
 0x1a4   : > { %v1113_v4 = vadd.f32 %v1112_v58, %v4279_v38  ;;  %v1144_v5 = vrot.slane %v1125_v59, 4  ;;  %v1062_v6 = vpop.f32.mrf.mxu3  ;;  %2115 = vmatpush.bf16.msra.mxu1 %v3144_v39  ;;  %v3093_v22 = vld [vmem:[%s4108_s9 + $0x310] sm:$0xf0]  ;;  %v1167_v40 = vsub.f32 %v4225_v19, %v4268_v27  ;;  %v3359_v19 = vld [vmem:[%s4108_s9 + $0x204] sm:$0xf] }
 0x1a5   : > { %v4296_v9 = vadd.f32 1e-05, %v1163_v63  ;;  %v1154_v10 = vmul.f32 %v4291_v0, %v4291_v0  ;;  %v4300_v12 = vadd.f32 %v1062_v6, %v1049_v1  ;;  %v1077_v13 = vpop.f32.mrf.mxu0  ;;  %v1150_v16 = vmul.f32 %v1131_v3, %v4135_v37  ;;  %2101 = vmatpush.bf16.msra.mxu0 %v3032_v45  ;;  %v3395_v1 = vld [vmem:[%s4108_s9 + $0x324] sm:$0xf]  ;;  %v2981_v32 = vld [vmem:[%s4108_s9 + $0x230] sm:$0xf0] }
 0x1a6   : > { %v1114_v17 = vrot.slane %v1113_v4, 2  ;;  %v1145_v18 = vadd.f32 %v1144_v5, %v1125_v59  ;;  %v1090_v20 = vpop.f32.mrf.mxu1  ;;  %2079 = vmatpush.bf16.msrb.mxu2 %v2712_v44  ;;  %v3016_v5 = vor.u32 %v3371_v56, %v3013_v57  ;;  %v3367_v6 = vld [vmem:[%s4108_s9 + $0x244] sm:$0xf]  ;;  %v3096_v39 = vor.u32 %v3391_v21, %v3093_v22  ;;  %v2965_v27 = vld [vmem:[%s4108_s9 + $0x210] sm:$0xf0] }
 0x1a7   : > { %3553 = vrsqrt.f32 %v4296_v9  ;;  %v1106_v23 = vrot.slane %v4300_v12, 4  ;;  %v1124_v24 = vmul.f32 %v4300_v12, %v4300_v12  ;;  %v1158_v26 = vsub.f32 %v1150_v16, %v1154_v10 }
 0x1a8   : > { %v1115_v28 = vadd.f32 %v1114_v17, %v1113_v4  ;;  %v1146_v29 = vrot.slane %v1145_v18, 2  ;;  %v3128_v4 = vor.u32 %v3399_v47, %v3125_v60  ;;  %v3112_v16 = vor.u32 %v3395_v1, %v3109_v2 }
 0x1a9   : > { %v1107_v34 = vadd.f32 %v1106_v23, %v4300_v12  ;;  %v1138_v35 = vrot.slane %v1124_v24, 4  ;;  %v1162_v33 = vmax.f32 %v1158_v26, 0.0  ;;  %2102 = vmatpush.bf16.msra.mxu0 %v3016_v5  ;;  %v3000_v20 = vor.u32 %v3367_v6, %v2997_v7  ;;  %v4339_v26 = vld [vmem:[#allocation11] sm:$0xf] }
 0x1aa   : > { %v1116_v41 = vrot.slane %v1115_v28, 1  ;;  %v1147_v42 = vadd.f32 %v1146_v29, %v1145_v18  ;;  %2116 = vmatpush.bf16.msra.mxu1 %v3128_v4  ;;  %vm1190_vm9 = vweird.f32 %v4296_v9  ;;  %v1233_v44 = vperm.slane %v4348_v36, 1 }
 0x1ab   : > { %v1108_v49 = vrot.slane %v1107_v34, 2  ;;  %v1139_v11 = vadd.f32 %v1138_v35, %v1124_v24  ;;  %v1051_v43 = vpop.f32.mrf.mxu2  ;;  %v4317_v48 = vadd.f32 1e-05, %v1162_v33  ;;  %v1166_v56 = vsub.f32 %v4243_v46, %v4291_v0  ;;  %v2939_v0 = vld [vmem:[%s4108_s9 + $0x1c8] sm:$0xf] }
 0x1ac   : > { %v1117_v50 = vadd.f32 %v1116_v41, %v1115_v28  ;;  %v1148_v51 = vrot.slane %v1147_v42, 1  ;;  %v1064_v53 = vpop.f32.mrf.mxu3  ;;  %v1219_v57 = vperm.slane %v4339_v26, 0  ;;  %v1232_v2 = vperm.slane %v4348_v36, 0 }
 0x1ad   : > { %v3554_v52 = vpop.eup %3553  ;;  %v1109_v54 = vadd.f32 %v1108_v49, %v1107_v34  ;;  %v1140_v55 = vrot.slane %v1139_v11, 2  ;;  %3555 = vrsqrt.f32 %v4317_v48  ;;  %2103 = vmatpush.bf16.msra.mxu0 %v3000_v20  ;;  %vm1180_vm12 = vweird.f32 %v4317_v48 }
 0x1ae   : > { %v1185_v58 = vmul.f32 %v3554_v52, %v4296_v9  ;;  %v4325_v59 = vmul.f32 %v1117_v50, %v4135_v37  ;;  %v1149_v61 = vadd.f32 %v1148_v51, %v1147_v42  ;;  %vm1191_vm8 = vweird.f32 %v3554_v52  ;;  %2117 = vmatpush.bf16.msra.mxu1 %v3112_v16  ;;  %v2923_v16 = vld [vmem:[%s4108_s9 + $0x1a8] sm:$0xf] }
 0x1af   : > { %v1110_v62 = vrot.slane %v1109_v54, 1  ;;  %v1141_v63 = vadd.f32 %v1140_v55, %v1139_v11  ;;  %vm1192_vm10 = vmor %vm1190_vm9, %vm1191_vm8  ;;  %v1220_v42 = vperm.slane %v4339_v26, 1  ;;  %v2968_v51 = vor.u32 %v3359_v19, %v2965_v27  ;;  %v3358_v55 = vld [vmem:[%s4108_s9 + $0x1f4] sm:$0xf0] }
 0x1b0   : > { %v1186_v3 = vmul.f32 %v3554_v52, %v1185_v58  ;;  %v1153_v8 = vmul.f32 %v1149_v61, %v4135_v37  ;;  %v1157_v10 = vmul.f32 %v4325_v59, %v4325_v59  ;;  %v1221_v27 = vperm.slane %v4339_v26, 2 }
 0x1b1   : > { %v1111_v13 = vadd.f32 %v1110_v62, %v1109_v54  ;;  %v1142_v15 = vrot.slane %v1141_v63, 1  ;;  %v2955_v54 = vld [vmem:[%s4108_s9 + $0x1e8] sm:$0xf] }
 0x1b2   : > { %v1187_v14 = vmul.f32 0.5, %v1186_v3  ;;  %v1161_v17 = vsub.f32 %v1153_v8, %v1157_v10  ;;  %2118 = vmatpush.bf16.msra.mxu1 %v3096_v39  ;;  %v2956_v1 = vor.u32 %v3358_v55, %v2955_v54  ;;  %v3354_v3 = vld [vmem:[%s4108_s9 + $0x1d4] sm:$0xf0]  ;;  %v1222_v39 = vperm.slane %v4339_v26, 3  ;;  %v2779_v54 = vld [vmem:[%s4108_s9 + $0x88] sm:$0xf] }
 0x1b3   : > { %v4335_v18 = vmul.f32 %v1111_v13, %v4135_v37  ;;  %v3556_v23 = vpop.eup %3555  ;;  %v1143_v25 = vadd.f32 %v1142_v15, %v1141_v63  ;;  %v2940_v8 = vor.u32 %v3354_v3, %v2939_v0  ;;  %v2827_v13 = vld [vmem:[%s4108_s9 + $0xe8] sm:$0xf]  ;;  %v3314_v55 = vld [vmem:[%s4108_s9 + $0x94] sm:$0xf0] }
 0x1b4   : > { %v1188_v24 = vsub.f32 1.5, %v1187_v14  ;;  %v1175_v28 = vmul.f32 %v3556_v23, %v4317_v48  ;;  %v1165_v29 = vmax.f32 %v1161_v17, 0.0  ;;  %vm1181_vm11 = vweird.f32 %v3556_v23  ;;  %v3326_v14 = vld [vmem:[%s4108_s9 + $0xf4] sm:$0xf0]  ;;  %v2875_v26 = vld [vmem:[%s4108_s9 + $0x148] sm:$0xf] }
 0x1b5   : > { %v1156_v30 = vmul.f32 %v4335_v18, %v4335_v18  ;;  %v1152_v35 = vmul.f32 %v1143_v25, %v4135_v37  ;;  %v2984_v37 = vor.u32 %v3363_v31, %v2981_v32  ;;  %vm1182_vm13 = vmor %vm1180_vm12, %vm1181_vm11  ;;  %v3350_v17 = vld [vmem:[%s4108_s9 + $0x1b4] sm:$0xf0]  ;;  %v1169_v31 = vsub.f32 %v4279_v38, %v4325_v59  ;;  %v3083_v0 = vld [vmem:[%s4108_s9 + $0x2e8] sm:$0xf] }
 0x1b6   : > { %v1189_v34 = vmul.f32 %v3554_v52, %v1188_v24  ;;  %v1176_v33 = vmul.f32 %v3556_v23, %v1175_v28  ;;  %v4353_v41 = vadd.f32 1e-05, %v1165_v29  ;;  %v2811_v24 = vld [vmem:[%s4108_s9 + $0xc8] sm:$0xf]  ;;  %v3322_v25 = vld [vmem:[%s4108_s9 + $0xd4] sm:$0xf0]  ;;  %v1168_v19 = vsub.f32 %v4300_v12, %v4335_v18 }
 0x1b7   : > { %v1160_v49 = vsub.f32 %v1152_v35, %v1156_v30  ;;  %2104 = vmatpush.bf16.msra.mxu0 %v2984_v37  ;;  %v2924_v30 = vor.u32 %v3350_v17, %v2923_v16  ;;  %v3346_v35 = vld [vmem:[%s4108_s9 + $0x194] sm:$0xf0]  ;;  %v1235_v38 = vperm.slane %v4348_v36, 3  ;;  %v1234_v12 = vperm.slane %v4348_v36, 2 }
 0x1b8   : > { %v1193_v9 = vsel %vm1192_vm10, %v3554_v52, %v1189_v34  ;;  %v1177_v43 = vmul.f32 0.5, %v1176_v33  ;;  %3557 = vrsqrt.f32 %v4353_v41  ;;  %vm1210_vm15 = vweird.f32 %v4353_v41  ;;  %v2907_v34 = vld [vmem:[%s4108_s9 + $0x188] sm:$0xf]  ;;  %v3390_v3 = vld [vmem:[%s4108_s9 + $0x2f4] sm:$0xf0] }
 0x1b9   : > { %v1215_v11 = vmul.f32 %v1193_v9, %v1167_v40  ;;  %v1164_v45 = vmax.f32 %v1160_v49, 0.0  ;;  %v2812_v33 = vor.u32 %v3322_v25, %v2811_v24  ;;  %v2908_v59 = vor.u32 %v3346_v35, %v2907_v34  ;;  %v2795_v9 = vld [vmem:[%s4108_s9 + $0xa8] sm:$0xf]  ;;  %v3318_v49 = vld [vmem:[%s4108_s9 + $0xb4] sm:$0xf0] }
 0x1ba   : > { %v1178_v47 = vsub.f32 1.5, %v1177_v43  ;;  %v2891_v43 = vld [vmem:[%s4108_s9 + $0x168] sm:$0xf]  ;;  %v3330_v25 = vld [vmem:[%s4108_s9 + $0x114] sm:$0xf0] }
 0x1bb   : > { %v1228_v50 = vmul.f32 %v1220_v42, %v1215_v11  ;;  %v4360_v53 = vadd.f32 1e-05, %v1164_v45  ;;  %2105 = vmatpush.bf16.msra.mxu0 %v2968_v51  ;;  %v3211_v51 = vld [vmem:[%s4108_s9 + $0x3e8] sm:$0xf]  ;;  %v3410_v35 = vld [vmem:[%s4108_s9 + $0x394] sm:$0xf0] }
 0x1bc   : > { %v1179_v60 = vmul.f32 %v3556_v23, %v1178_v47  ;;  %v2796_v47 = vor.u32 %v3318_v49, %v2795_v9  ;;  %v2843_v24 = vld [vmem:[%s4108_s9 + $0x108] sm:$0xf]  ;;  %v3352_v49 = vld [vmem:[%s4108_s9 + $0x1cc] sm:$0xf] }
 0x1bd   : > { %v1241_v52 = vadd.f32 %v1233_v44, %v1228_v50  ;;  %3559 = vrsqrt.f32 %v4360_v53  ;;  %vm1200_vm2 = vweird.f32 %v4360_v53  ;;  %v3342_v44 = vld [vmem:[%s4108_s9 + $0x174] sm:$0xf0]  ;;  %v3163_v34 = vld [vmem:[%s4108_s9 + $0x388] sm:$0xf] }
 0x1be   : > { %v3558_v58 = vpop.eup %3557  ;;  %v1183_v61 = vsel %vm1182_vm13, %v3556_v23, %v1179_v60  ;;  %v2828_v23 = vor.u32 %v3326_v14, %v2827_v13  ;;  %v3422_v60 = vld [vmem:[%s4108_s9 + $0x3f4] sm:$0xf0]  ;;  %v3179_v13 = vld [vmem:[%s4108_s9 + $0x3a8] sm:$0xf]  ;;  %v3164_v9 = vor.u32 %v3410_v35, %v3163_v34  ;;  %v3312_v35 = vld [vmem:[%s4108_s9 + $0x8c] sm:$0xf] }
 0x1bf   : > { %v1245_v62 = vmax.f32 %v1241_v52, 0.0  ;;  %v1214_v63 = vmul.f32 %v1183_v61, %v1166_v56  ;;  %v1205_v48 = vmul.f32 %v3558_v58, %v4353_v41  ;;  %vm1211_vm14 = vweird.f32 %v3558_v58  ;;  %v3338_v56 = vld [vmem:[%s4108_s9 + $0x154] sm:$0xf0] }
 0x1c0   : > { %vm1212_vm0 = vmor %vm1210_vm15, %vm1211_vm14  ;;  %v2892_v52 = vor.u32 %v3342_v44, %v2891_v43  ;;  %v2876_v36 = vor.u32 %v3338_v56, %v2875_v26  ;;  %v3414_v14 = vld [vmem:[%s4108_s9 + $0x3b4] sm:$0xf0]  ;;  %v3147_v43 = vld [vmem:[%s4108_s9 + $0x368] sm:$0xf] }
 0x1c1   : > { %v4371_v46 = vpack.c.bf16 %v1245_v62, %v1245_v62  ;;  %v1206_v4 = vmul.f32 %v3558_v58, %v1205_v48  ;;  %v1227_v5 = vmul.f32 %v1219_v57, %v1214_v63  ;;  %v3212_v57 = vor.u32 %v3422_v60, %v3211_v51  ;;  %v3195_v63 = vld [vmem:[%s4108_s9 + $0x3c8] sm:$0xf]  ;;  %v3418_v48 = vld [vmem:[%s4108_s9 + $0x3d4] sm:$0xf0]  ;;  %v3324_v60 = vld [vmem:[%s4108_s9 + $0xec] sm:$0xf] }
 0x1c2   : > { %v2780_v62 = vor.u32 %v3314_v55, %v2779_v54  ;;  %v3406_v44 = vld [vmem:[%s4108_s9 + $0x374] sm:$0xf0]  ;;  %v3348_v54 = vld [vmem:[%s4108_s9 + $0x1ac] sm:$0xf]  ;;  %v2925_v55 = vld [vmem:[%s4108_s9 + $0x1b8] sm:$0xf0] }
 0x1c3   : > { %2041 = vmatmul.bf16.vlgmr.msra.gmra.mxu3 %v4371_v46  ;;  %v3560_v6 = vpop.eup %3559  ;;  %v1207_v7 = vmul.f32 0.5, %v1206_v4  ;;  %v1240_v10 = vadd.f32 %v1232_v2, %v1227_v5  ;;  %v2763_v2 = vld [vmem:[%s4108_s9 + $0x68] sm:$0xf]  ;;  %v3310_v4 = vld [vmem:[%s4108_s9 + $0x74] sm:$0xf0] }
 0x1c4   : > { %2137 = vmatpush.bf16.msra.mxu3 %v2956_v1  ;;  %v1195_v15 = vmul.f32 %v3560_v6, %v4360_v53  ;;  %vm1201_vm1 = vweird.f32 %v3560_v6  ;;  %v2859_v5 = vld [vmem:[%s4108_s9 + $0x128] sm:$0xf]  ;;  %v2764_v16 = vor.u32 %v3310_v4, %v2763_v2  ;;  %v3298_v51 = vld [vmem:[%s4108_s9 + $0x14] sm:$0xf0]  ;;  %v3344_v2 = vld [vmem:[%s4108_s9 + $0x18c] sm:$0xf] }
 0x1c5   : > { %v1208_v20 = vsub.f32 1.5, %v1207_v7  ;;  %v1244_v21 = vmax.f32 %v1240_v10, 0.0  ;;  %vm1202_vm3 = vmor %vm1200_vm2, %vm1201_vm1  ;;  %v3196_v7 = vor.u32 %v3418_v48, %v3195_v63  ;;  %v3084_v10 = vor.u32 %v3390_v3, %v3083_v0  ;;  %v3402_v26 = vld [vmem:[%s4108_s9 + $0x354] sm:$0xf0]  ;;  %v3320_v48 = vld [vmem:[%s4108_s9 + $0xcc] sm:$0xf] }
 0x1c6   : > { %v1196_v22 = vmul.f32 %v3560_v6, %v1195_v15  ;;  %v2928_v63 = vor.u32 %v3348_v54, %v2925_v55  ;;  %v2909_v0 = vld [vmem:[%s4108_s9 + $0x198] sm:$0xf0]  ;;  %v3115_v4 = vld [vmem:[%s4108_s9 + $0x328] sm:$0xf]  ;;  %v3384_v55 = vld [vmem:[%s4108_s9 + $0x2cc] sm:$0xf] }
 0x1c7   : > { %v1209_v28 = vmul.f32 %v3558_v58, %v1208_v20  ;;  %v4384_v29 = vpack.c.bf16 %v1244_v21, %v1244_v21  ;;  %v2747_v20 = vld [vmem:[%s4108_s9 + $0x48] sm:$0xf] }
 0x1c8   : > { %2138 = vmatpush.bf16.msra.mxu3 %v2940_v8  ;;  %v1197_v32 = vmul.f32 0.5, %v1196_v22  ;;  %v3067_v21 = vld [vmem:[%s4108_s9 + $0x2c8] sm:$0xf]  ;;  %v3386_v22 = vld [vmem:[%s4108_s9 + $0x2d4] sm:$0xf0] }
 0x1c9   : > { %v1213_v40 = vsel %vm1212_vm0, %v3558_v58, %v1209_v28  ;;  %2028 = vmatmul.bf16.vlgmr.msra.gmra.mxu2 %v4384_v29  ;;  %v3180_v28 = vor.u32 %v3414_v14, %v3179_v13  ;;  %v3316_v13 = vld [vmem:[%s4108_s9 + $0xac] sm:$0xf] }
 0x1ca   : > { %v1217_v41 = vmul.f32 %v1213_v40, %v1169_v31  ;;  %v1198_v42 = vsub.f32 1.5, %v1197_v32  ;;  %2124 = vmatpush.bf16.msra.mxu2 %v2828_v23  ;;  %v3306_v23 = vld [vmem:[%s4108_s9 + $0x54] sm:$0xf0]  ;;  %v2957_v31 = vld [vmem:[%s4108_s9 + $0x1f8] sm:$0xf0]  ;;  %v3068_v32 = vor.u32 %v3386_v22, %v3067_v21  ;;  %v2844_v40 = vor.u32 %v3330_v25, %v2843_v24 }
 0x1cb   : > { %v3099_v22 = vld [vmem:[%s4108_s9 + $0x308] sm:$0xf]  ;;  %v3420_v24 = vld [vmem:[%s4108_s9 + $0x3ec] sm:$0xf]  ;;  %v3213_v25 = vld [vmem:[%s4108_s9 + $0x3f8] sm:$0xf0] }
 0x1cc   : > { %2139 = vmatpush.bf16.msra.mxu3 %v2924_v30  ;;  %v1199_v37 = vmul.f32 %v3560_v6, %v1198_v42  ;;  %v1230_v11 = vmul.f32 %v1222_v39, %v1217_v41  ;;  %v3356_v30 = vld [vmem:[%s4108_s9 + $0x1ec] sm:$0xf]  ;;  %v2748_v39 = vor.u32 %v3306_v23, %v2747_v20  ;;  %v3382_v41 = vld [vmem:[%s4108_s9 + $0x2b4] sm:$0xf0]  ;;  %v2893_v20 = vld [vmem:[%s4108_s9 + $0x178] sm:$0xf0] }
 0x1cd   : > { %v2960_v42 = vor.u32 %v3356_v30, %v2957_v31  ;;  %v3394_v23 = vld [vmem:[%s4108_s9 + $0x314] sm:$0xf0] }
 0x1ce   : > { %v1203_v45 = vsel %vm1202_vm3, %v3560_v6, %v1199_v37  ;;  %2125 = vmatpush.bf16.msra.mxu2 %v2812_v33  ;;  %v1243_v50 = vadd.f32 %v1235_v38, %v1230_v11  ;;  %v3334_v6 = vld [vmem:[%s4108_s9 + $0x134] sm:$0xf0]  ;;  %v3051_v33 = vld [vmem:[%s4108_s9 + $0x2a8] sm:$0xf]  ;;  %v2941_v37 = vld [vmem:[%s4108_s9 + $0x1d8] sm:$0xf0]  ;;  %v3100_v34 = vor.u32 %v3394_v23, %v3099_v22 }
 0x1cf   : > { %v1216_v53 = vmul.f32 %v1203_v45, %v1168_v19  ;;  %v2860_v17 = vor.u32 %v3334_v6, %v2859_v5  ;;  %v2731_v38 = vld [vmem:[%s4108_s9 + $0x28] sm:$0xf]  ;;  %v3052_v11 = vor.u32 %v3382_v41, %v3051_v33  ;;  %v3378_v45 = vld [vmem:[%s4108_s9 + $0x294] sm:$0xf0]  ;;  %v3336_v41 = vld [vmem:[%s4108_s9 + $0x14c] sm:$0xf] }
 0x1d0   : > { %2140 = vmatpush.bf16.msra.mxu3 %v2908_v59  ;;  %v1247_v18 = vmax.f32 %v1243_v50, 0.0  ;;  %v3302_v59 = vld [vmem:[%s4108_s9 + $0x34] sm:$0xf0]  ;;  %v2715_v50 = vld [vmem:[%s4108_s9 + $0x8] sm:$0xf] }
 0x1d1   : > { %v1229_v58 = vmul.f32 %v1221_v27, %v1216_v53  ;;  %v2732_v19 = vor.u32 %v3302_v59, %v2731_v38  ;;  %v3035_v27 = vld [vmem:[%s4108_s9 + $0x288] sm:$0xf]  ;;  %v3148_v53 = vor.u32 %v3406_v44, %v3147_v43  ;;  %v2716_v56 = vor.u32 %v3298_v51, %v2715_v50  ;;  %v3398_v5 = vld [vmem:[%s4108_s9 + $0x334] sm:$0xf0]  ;;  %v3416_v38 = vld [vmem:[%s4108_s9 + $0x3cc] sm:$0xf] }
 0x1d2   : > { %2126 = vmatpush.bf16.msra.mxu2 %v2796_v47  ;;  %v4408_v61 = vpack.c.bf16 %v1247_v18, %v1247_v18  ;;  %v2944_v47 = vor.u32 %v3352_v49, %v2941_v37  ;;  %v3131_v18 = vld [vmem:[%s4108_s9 + $0x348] sm:$0xf]  ;;  %v3116_v14 = vor.u32 %v3398_v5, %v3115_v4  ;;  %v3366_v30 = vld [vmem:[%s4108_s9 + $0x234] sm:$0xf0]  ;;  %v3197_v59 = vld [vmem:[%s4108_s9 + $0x3d8] sm:$0xf0] }
 0x1d3   : > { %2093 = vmatmul.bf16.vlgmr.msrb.gmra.mxu3 %v4371_v46  ;;  %v1242_v1 = vadd.f32 %v1234_v12, %v1229_v58  ;;  %v3036_v12 = vor.u32 %v3378_v45, %v3035_v27  ;;  %v3374_v58 = vld [vmem:[%s4108_s9 + $0x274] sm:$0xf0]  ;;  %v3003_v6 = vld [vmem:[%s4108_s9 + $0x248] sm:$0xf]  ;;  %v3085_v43 = vld [vmem:[%s4108_s9 + $0x2f8] sm:$0xf0]  ;;  %v3200_v45 = vor.u32 %v3416_v38, %v3197_v59 }
 0x1d4   : > { %2141 = vmatpush.bf16.msra.mxu3 %v2892_v52  ;;  %2067 = vmatmul.bf16.vlgmr.msrb.gmra.mxu1 %v4408_v61  ;;  %v2829_v52 = vld [vmem:[%s4108_s9 + $0xf8] sm:$0xf0]  ;;  %v3362_v49 = vld [vmem:[%s4108_s9 + $0x214] sm:$0xf0]  ;;  %v3332_v50 = vld [vmem:[%s4108_s9 + $0x12c] sm:$0xf] }
 0x1d5   : > { %2163 = vmatpush.bf16.msrb.mxu1 %v3212_v57  ;;  %v1246_v8 = vmax.f32 %v1242_v1, 0.0  ;;  %v3019_v57 = vld [vmem:[%s4108_s9 + $0x268] sm:$0xf]  ;;  %v2813_v1 = vld [vmem:[%s4108_s9 + $0xd8] sm:$0xf0] }
 0x1d6   : > { %2127 = vmatpush.bf16.msra.mxu2 %v2780_v62  ;;  %v2832_v62 = vor.u32 %v3324_v60, %v2829_v52  ;;  %v3020_v3 = vor.u32 %v3374_v58, %v3019_v57  ;;  %v2765_v27 = vld [vmem:[%s4108_s9 + $0x78] sm:$0xf0]  ;;  %v3328_v58 = vld [vmem:[%s4108_s9 + $0x10c] sm:$0xf] }
 0x1d7   : > { %v4422_v15 = vpack.c.bf16 %v1246_v8, %v1246_v8  ;;  %v2816_v8 = vor.u32 %v3320_v48, %v2813_v1  ;;  %v2861_v51 = vld [vmem:[%s4108_s9 + $0x138] sm:$0xf0]  ;;  %v3408_v48 = vld [vmem:[%s4108_s9 + $0x38c] sm:$0xf] }
 0x1d8   : > { %2142 = vmatpush.bf16.msra.mxu3 %v2876_v36  ;;  %v3132_v36 = vor.u32 %v3402_v26, %v3131_v18  ;;  %v3181_v52 = vld [vmem:[%s4108_s9 + $0x3b8] sm:$0xf0]  ;;  %v2864_v18 = vor.u32 %v3332_v50, %v2861_v51  ;;  %v3304_v26 = vld [vmem:[%s4108_s9 + $0x4c] sm:$0xf] }
 0x1d9   : > { %2164 = vmatpush.bf16.msrb.mxu1 %v3196_v7  ;;  %2054 = vmatmul.bf16.vlgmr.msrb.gmra.mxu0 %v4422_v15  ;;  %v3370_v7 = vld [vmem:[%s4108_s9 + $0x254] sm:$0xf0]  ;;  %v3300_v4 = vld [vmem:[%s4108_s9 + $0x2c] sm:$0xf]  ;;  %v2733_v5 = vld [vmem:[%s4108_s9 + $0x38] sm:$0xf0] }
 0x1da   : > { %2080 = vmatmul.bf16.vlgmr.msrb.gmra.mxu2 %v4384_v29  ;;  %2150 = vmatpush.bf16.msrb.mxu0 %v3084_v10  ;;  %v2912_v10 = vor.u32 %v3344_v2, %v2909_v0  ;;  %v3004_v21 = vor.u32 %v3370_v7, %v3003_v6  ;;  %v3380_v2 = vld [vmem:[%s4108_s9 + $0x2ac] sm:$0xf]  ;;  %v3053_v0 = vld [vmem:[%s4108_s9 + $0x2b8] sm:$0xf0] }
 0x1db   : > { %2128 = vmatpush.bf16.msra.mxu2 %v2764_v16  ;;  %v2797_v16 = vld [vmem:[%s4108_s9 + $0xb8] sm:$0xf0]  ;;  %v3056_v7 = vor.u32 %v3380_v2, %v3053_v0  ;;  %v3400_v23 = vld [vmem:[%s4108_s9 + $0x34c] sm:$0xf] }
 0x1dc   : > { %2143 = vmatpush.bf16.msra.mxu3 %v2860_v17  ;;  %v3340_v17 = vld [vmem:[%s4108_s9 + $0x16c] sm:$0xf]  ;;  %v2800_v31 = vor.u32 %v3316_v13, %v2797_v16  ;;  %v2736_v13 = vor.u32 %v3300_v4, %v2733_v5  ;;  %v3037_v16 = vld [vmem:[%s4108_s9 + $0x298] sm:$0xf0] }
 0x1dd   : > { %2165 = vmatpush.bf16.msrb.mxu1 %v3180_v28  ;;  %v2987_v28 = vld [vmem:[%s4108_s9 + $0x228] sm:$0xf]  ;;  %v3364_v38 = vld [vmem:[%s4108_s9 + $0x22c] sm:$0xf]  ;;  %v2989_v59 = vld [vmem:[%s4108_s9 + $0x238] sm:$0xf0] }
 0x1de   : > { %2151 = vmatpush.bf16.msrb.mxu0 %v3068_v32  ;;  %v2896_v32 = vor.u32 %v3340_v17, %v2893_v20  ;;  %v2988_v33 = vor.u32 %v3366_v30, %v2987_v28  ;;  %v3296_v17 = vld [vmem:[%s4108_s9 + $0xc] sm:$0xf]  ;;  %v2717_v20 = vld [vmem:[%s4108_s9 + $0x18] sm:$0xf0] }
 0x1df   : > { %2129 = vmatpush.bf16.msra.mxu2 %v2748_v39  ;;  %v2781_v39 = vld [vmem:[%s4108_s9 + $0x98] sm:$0xf0]  ;;  %v3372_v28 = vld [vmem:[%s4108_s9 + $0x26c] sm:$0xf] }
 0x1e0   : > { %2144 = vmatpush.bf16.msra.mxu3 %v2844_v40  ;;  %v3216_v40 = vor.u32 %v3420_v24, %v3213_v25  ;;  %v2784_v37 = vor.u32 %v3312_v35, %v2781_v39  ;;  %v3133_v24 = vld [vmem:[%s4108_s9 + $0x358] sm:$0xf0]  ;;  %v2720_v25 = vor.u32 %v3296_v17, %v2717_v20  ;;  %v3368_v39 = vld [vmem:[%s4108_s9 + $0x24c] sm:$0xf] }
 0x1e1   : > { %2166 = vmatpush.bf16.msrb.mxu1 %v3164_v9  ;;  %v2971_v9 = vld [vmem:[%s4108_s9 + $0x208] sm:$0xf]  ;;  %v3021_v30 = vld [vmem:[%s4108_s9 + $0x278] sm:$0xf0] }
 0x1e2   : > { %2152 = vmatpush.bf16.msrb.mxu0 %v3052_v11  ;;  %v3388_v11 = vld [vmem:[%s4108_s9 + $0x2ec] sm:$0xf]  ;;  %v3117_v35 = vld [vmem:[%s4108_s9 + $0x338] sm:$0xf0] }
 0x1e3   : > { %2145 = vmatmul.bf16.vlgmr.msra.gmra.mxu3 %v4371_v46  ;;  %2130 = vmatpush.bf16.msra.mxu2 %v2732_v19  ;;  %v3308_v19 = vld [vmem:[%s4108_s9 + $0x6c] sm:$0xf]  ;;  %v3088_v60 = vor.u32 %v3388_v11, %v3085_v43  ;;  %v2973_v11 = vld [vmem:[%s4108_s9 + $0x218] sm:$0xf0] }
 0x1e4   : > { %2189 = vmatpush.bf16.msrb.mxu3 %v2960_v42  ;;  %2119 = vmatmul.bf16.vlgmr.msra.gmra.mxu1 %v4408_v61  ;;  %v2877_v42 = vld [vmem:[%s4108_s9 + $0x158] sm:$0xf0]  ;;  %v2768_v54 = vor.u32 %v3308_v19, %v2765_v27 }
 0x1e5   : > { %2167 = vmatpush.bf16.msrb.mxu1 %v3148_v53  ;;  %v2880_v44 = vor.u32 %v3336_v41, %v2877_v42  ;;  %v3412_v53 = vld [vmem:[%s4108_s9 + $0x3ac] sm:$0xf]  ;;  %v3101_v42 = vld [vmem:[%s4108_s9 + $0x318] sm:$0xf0] }
 0x1e6   : > { %2153 = vmatpush.bf16.msrb.mxu0 %v3036_v12  ;;  %v3069_v12 = vld [vmem:[%s4108_s9 + $0x2d8] sm:$0xf0]  ;;  %v3184_v57 = vor.u32 %v3412_v53, %v3181_v52  ;;  %v3392_v41 = vld [vmem:[%s4108_s9 + $0x30c] sm:$0xf] }
 0x1e7   : > { %2131 = vmatpush.bf16.msra.mxu2 %v2716_v56  ;;  %v2749_v56 = vld [vmem:[%s4108_s9 + $0x58] sm:$0xf0] }
 0x1e8   : > { %2190 = vmatpush.bf16.msrb.mxu3 %v2944_v47  ;;  %v2972_v47 = vor.u32 %v3362_v49, %v2971_v9  ;;  %v2752_v1 = vor.u32 %v3304_v26, %v2749_v56  ;;  %v3104_v9 = vor.u32 %v3392_v41, %v3101_v42  ;;  %v2992_v49 = vor.u32 %v3364_v38, %v2989_v59 }
 0x1e9   : > { %2168 = vmatpush.bf16.msrb.mxu1 %v3132_v36  ;;  %2106 = vmatmul.bf16.vlgmr.msra.gmra.mxu0 %v4422_v15  ;;  %v3165_v36 = vld [vmem:[%s4108_s9 + $0x398] sm:$0xf0] }
 0x1ea   : > { %2132 = vmatmul.bf16.vlgmr.msra.gmra.mxu2 %v4384_v29  ;;  %2154 = vmatpush.bf16.msrb.mxu0 %v3020_v3  ;;  %v3168_v6 = vor.u32 %v3408_v48, %v3165_v36 }
 0x1eb   : > { %2176 = vmatpush.bf16.msrb.mxu2 %v2832_v62  ;;  %v2845_v62 = vld [vmem:[%s4108_s9 + $0x118] sm:$0xf0] }
 0x1ec   : > { %2191 = vmatpush.bf16.msrb.mxu3 %v2928_v63  ;;  %v3072_v63 = vor.u32 %v3384_v55, %v3069_v12  ;;  %v2848_v3 = vor.u32 %v3328_v58, %v2845_v62 }
 0x1ed   : > { %2169 = vmatpush.bf16.msrb.mxu1 %v3116_v14  ;;  %v3376_v14 = vld [vmem:[%s4108_s9 + $0x28c] sm:$0xf] }
 0x1ee   : > { %2155 = vmatpush.bf16.msrb.mxu0 %v3004_v21  ;;  %v3040_v22 = vor.u32 %v3376_v14, %v3037_v16 }
 0x1ef   : > { %2177 = vmatpush.bf16.msrb.mxu2 %v2816_v8  ;;  %v3404_v8 = vld [vmem:[%s4108_s9 + $0x36c] sm:$0xf] }
 0x1f0   : > { %2192 = vmatpush.bf16.msrb.mxu3 %v2912_v10  ;;  %v3149_v10 = vld [vmem:[%s4108_s9 + $0x378] sm:$0xf0] }
 0x1f1   : > { %2170 = vmatpush.bf16.msrb.mxu1 %v3100_v34  ;;  %v3152_v21 = vor.u32 %v3404_v8, %v3149_v10  ;;  %v3396_v34 = vld [vmem:[%s4108_s9 + $0x32c] sm:$0xf] }
 0x1f2   : > { %2156 = vmatpush.bf16.msrb.mxu0 %v2988_v33 }
 0x1f3   : > { %2178 = vmatpush.bf16.msrb.mxu2 %v2800_v31  ;;  %v3136_v31 = vor.u32 %v3400_v23, %v3133_v24 }
 0x1f4   : > { %2193 = vmatpush.bf16.msrb.mxu3 %v2896_v32  ;;  %2171 = vmatmul.bf16.vlgmr.msrb.gmra.mxu1 %v4408_v61  ;;  %v3024_v32 = vor.u32 %v3372_v28, %v3021_v30 }
 0x1f5   : > { %2215 = vmatpush.bf16.msra.mxu1 %v3216_v40  ;;  %v3005_v40 = vld [vmem:[%s4108_s9 + $0x258] sm:$0xf0] }
 0x1f6   : > { %2157 = vmatpush.bf16.msrb.mxu0 %v2972_v47  ;;  %v3008_v33 = vor.u32 %v3368_v39, %v3005_v40 }
 0x1f7   : > { %2179 = vmatpush.bf16.msrb.mxu2 %v2784_v37  ;;  %v3360_v37 = vld [vmem:[%s4108_s9 + $0x20c] sm:$0xf] }
 0x1f8   : > { %2194 = vmatpush.bf16.msrb.mxu3 %v2880_v44  ;;  %v2976_v43 = vor.u32 %v3360_v37, %v2973_v11 }
 0x1f9   : > { %2216 = vmatpush.bf16.msra.mxu1 %v3200_v45  ;;  %2158 = vmatmul.bf16.vlgmr.msrb.gmra.mxu0 %v4422_v15 }
 0x1fa   : > { %2202 = vmatpush.bf16.msra.mxu0 %v3088_v60 }
 0x1fb   : > { %2180 = vmatpush.bf16.msrb.mxu2 %v2768_v54 }
 0x1fc   : > { %2195 = vmatpush.bf16.msrb.mxu3 %v2864_v18 }
 0x1fd   : > { %2217 = vmatpush.bf16.msra.mxu1 %v3184_v57 }
 0x1fe   : > { %2203 = vmatpush.bf16.msra.mxu0 %v3072_v63 }
 0x1ff   : > { %2181 = vmatpush.bf16.msrb.mxu2 %v2752_v1 }
 0x200   : > { %2196 = vmatpush.bf16.msrb.mxu3 %v2848_v3 }
 0x201   : > { %2218 = vmatpush.bf16.msra.mxu1 %v3168_v6 }
 0x202   : > { %2204 = vmatpush.bf16.msra.mxu0 %v3056_v7 }
 0x203   : > { %2182 = vmatpush.bf16.msrb.mxu2 %v2736_v13  ;;  %2197 = vmatmul.bf16.vlgmr.msrb.gmra.mxu3 %v4371_v46  ;;  %v3120_v46 = vor.u32 %v3396_v34, %v3117_v35 }
 0x205   : > { %2219 = vmatpush.bf16.msra.mxu1 %v3152_v21 }
 0x206   : > { %2205 = vmatpush.bf16.msra.mxu0 %v3040_v22 }
 0x207   : > { %2183 = vmatpush.bf16.msrb.mxu2 %v2720_v25 }
 0x209   : > { %2220 = vmatpush.bf16.msra.mxu1 %v3136_v31 }
 0x20a   : > { %2184 = vmatmul.bf16.vlgmr.msrb.gmra.mxu2 %v4384_v29  ;;  %2206 = vmatpush.bf16.msra.mxu0 %v3024_v32 }
 0x20d   : > { %2221 = vmatpush.bf16.msra.mxu1 %v3120_v46 }
 0x20e   : > { %2207 = vmatpush.bf16.msra.mxu0 %v3008_v33 }
 0x211   : > { %2222 = vmatpush.bf16.msra.mxu1 %v3104_v9 }
 0x212   : > { %2208 = vmatpush.bf16.msra.mxu0 %v2992_v49 }
 0x214   : > { %2223 = vmatmul.bf16.vlgmr.msra.gmra.mxu1 %v4408_v61 }
 0x216   : > { %2209 = vmatpush.bf16.msra.mxu0 %v2976_v43 }
 0x219   : > { %2210 = vmatmul.bf16.vlgmr.msra.gmra.mxu0 %v4422_v15 }
 0x246   : > { %v2042_v29 = vpop.f32.mrf.mxu3 }
 0x24c   : > { %v2029_v44 = vpop.f32.mrf.mxu2 }
 0x24d   : > { %v2043_v47 = vadd.f32 %v2042_v29, %v2029_v44 }
 0x24e   : > { %v2044_v19 = vpop.f32.mrf.mxu3 }
 0x251   : > { %v2068_v27 = vpop.f32.mrf.mxu1 }
 0x254   : > { %v2031_v45 = vpop.f32.mrf.mxu2 }
 0x256   : > { %v2094_v50 = vpop.f32.mrf.mxu3  ;;  %v2055_v51 = vpop.f32.mrf.mxu0 }
 0x257   : > { %v2056_v60 = vadd.f32 %v2055_v51, %v2043_v47 }
 0x259   : > { %v2069_v53 = vadd.f32 %v2068_v27, %v2056_v60  ;;  %v2070_v52 = vpop.f32.mrf.mxu1 }
 0x25b   : > { %3561 = vtanh.f32 %v2069_v53 }
 0x25d   : > { %v2081_v54 = vpop.f32.mrf.mxu2 }
 0x25e   : > { %v2096_v55 = vpop.f32.mrf.mxu3  ;;  %v2057_v12 = vpop.f32.mrf.mxu0  ;;  %v2095_v15 = vadd.f32 %v2094_v50, %v2081_v54 }
 0x261   : > { %v3562_v61 = vpop.eup %3561  ;;  %v2120_v18 = vpop.f32.mrf.mxu1 }
 0x262   : > { %2232 = vst [vmem:[%s4533_s19] sm:$0xff] %v3562_v61 }
 0x265   : > { %v2083_v26 = vpop.f32.mrf.mxu2 }
 0x266   : > { %v2146_v56 = vpop.f32.mrf.mxu3  ;;  %v2107_v57 = vpop.f32.mrf.mxu0 }
 0x267   : > { %v2108_v58 = vadd.f32 %v2107_v57, %v2095_v15 }
 0x269   : > { %v2121_v62 = vadd.f32 %v2120_v18, %v2108_v58  ;;  %v2122_v63 = vpop.f32.mrf.mxu1 }
 0x26b   : > { %3563 = vtanh.f32 %v2121_v62 }
 0x26d   : > { %v2133_v48 = vpop.f32.mrf.mxu2 }
 0x26e   : > { %v2148_v36 = vpop.f32.mrf.mxu3  ;;  %v2109_v1 = vpop.f32.mrf.mxu0  ;;  %v2147_v3 = vadd.f32 %v2146_v56, %v2133_v48 }
 0x271   : > { %v3564_v2 = vpop.eup %3563  ;;  %v2172_v0 = vpop.f32.mrf.mxu1 }
 0x272   : > { %2233 = vst [vmem:[%s4533_s19 + $0x8] sm:$0xff] %v3564_v2 }
 0x275   : > { %v2135_v4 = vpop.f32.mrf.mxu2 }
 0x276   : > { %v2159_v5 = vpop.f32.mrf.mxu0 }
 0x277   : > { %v2160_v6 = vadd.f32 %v2159_v5, %v2147_v3 }
 0x279   : > { %v2173_v7 = vadd.f32 %v2172_v0, %v2160_v6  ;;  %v2174_v8 = vpop.f32.mrf.mxu1 }
 0x27b   : > { %3565 = vtanh.f32 %v2173_v7 }
 0x27e   : > { %v2161_v10 = vpop.f32.mrf.mxu0 }
 0x281   : > { %v3566_v13 = vpop.eup %3565 }
 0x282   : > { %2234 = vst [vmem:[%s4533_s19 + $0x10] sm:$0xff] %v3566_v13 }
 0x286   : > { %v2198_v14 = vpop.f32.mrf.mxu3 }
 0x28d   : > { %v2185_v16 = vpop.f32.mrf.mxu2 }
 0x28e   : > { %v2200_v17 = vpop.f32.mrf.mxu3  ;;  %v2199_v21 = vadd.f32 %v2198_v14, %v2185_v16 }
 0x291   : > { %v2224_v20 = vpop.f32.mrf.mxu1 }
 0x295   : > { %v2187_v22 = vpop.f32.mrf.mxu2 }
 0x296   : > { %v2211_v23 = vpop.f32.mrf.mxu0 }
 0x297   : > { %v2212_v24 = vadd.f32 %v2211_v23, %v2199_v21 }
 0x299   : > { %v2225_v25 = vadd.f32 %v2224_v20, %v2212_v24  ;;  %v2226_v28 = vpop.f32.mrf.mxu1 }
 0x29b   : > { %3567 = vtanh.f32 %v2225_v25 }
 0x29e   : > { %v2213_v30 = vpop.f32.mrf.mxu0 }
 0x2a1   : > { %v3568_v31 = vpop.eup %3567 }
 0x2a2   : > { %2235 = vst [vmem:[%s4533_s19 + $0x18] sm:$0xff] %v3568_v31 }
 0x2a3   : > { %3836 = shalt.err (!%p3833_p8)
}
 0x2a4   : > { %3454 = dma.vmem_to_hbm [thread:$0]  (%p4053_p13), %s2251_s17, 512, %s2253_s20, %s2237_s25  }
 0x2a5 PF: > { %p3501_p9 = scmp.ge.s32.totalorder %s3891_s30, 2  ;;  %s2264_s0 = sand.u32 1, %s3879_s27  }
 0x2a6   : > { %s2265_s10 = scalar_lea.sflag [#allocation4], %s2264_s0 }
 0x2a7   : > { %p3483_p10 = pnand %p3501_p9, %p4059_p4 }
 0x2a9   : > { %p3484_p11 = pneg %p3483_p10 }
 0x2ab   : > { %3874 = dma.done.wait (%p3484_p11), %s2265_s10, 512  }
 0x2ac   : > { %3876 = vsyncadd (%p3484_p11), %s2265_s10, 4294966784  ;;  %p25_p0 = scmp.ge.s32.totalorder %s4029_s11, 6   ;;  %s4598_s27 = smov %s3883_s28 }
 0x2ad   : > { %s4599_s28 = smov %s3887_s29  ;;  %s4600_s29 = smov %s4041_s24 }
 0x2ae   : > { %s4601_s30 = smov %s4029_s11  ;;  %27 = sbr.rel (!%p25_p0) target bundleno = 13 (0xd), region = 126 }
 0x2b3   :  { %2271 = vsyncpa [#allocation3], 1 }
 0x2b4   :  { %2273 = vsyncpa [#allocation3 + $0x1], 1 }
 0x2b5   :  { %2274 = vsyncpa [#allocation6], 1 }
 0x2b6   :  { %2275 = vsyncpa [#allocation9], 1 }
 0x2b7   :  { %2276 = vsyncpa [#allocation12], 1 }
 0x2b8   :  { %2277 = vsyncpa [#allocation15], 1 }
 0x2b9   :  { %2279 = vsyncpa [#allocation15 + $0x1], 1 }
 0x2ba   :  { %2280 = vsyncpa [#allocation4], 1 }
 0x2bb   :  { %2282 = vsyncpa [#allocation4 + $0x1], 1 }

</bundles_post_ra>
